<compile_context>
chip_gen: v6e
topology: v6e:2x2x1
jax: 0.10.0
libtpu: 0.0.40
codegen_flags: <defaults>
</compile_context>

<pallas_src>
import jax
import jax.numpy as jnp
from jax.experimental import pallas as pl
from jax.experimental.pallas import tpu as pltpu

# ----- model hyperparameters (small, consistent with the module) -----
EMBED_DIM = 32          # embedding_dim
FFN_DIM = 64            # ffn_embedding_dim
NUM_HEADS = 4           # num_attention_heads
HEAD_DIM = EMBED_DIM // NUM_HEADS
SCALING = HEAD_DIM ** -0.5
LN_EPS = 1e-5           # torch.nn.LayerNorm default eps


def _layer_norm(y, gamma, beta):
    mu = jnp.mean(y, axis=-1, keepdims=True)
    var = jnp.mean((y - mu) ** 2, axis=-1, keepdims=True)
    return (y - mu) * jax.lax.rsqrt(var + LN_EPS) * gamma + beta


def _encoder_layer_kernel(
    x_ref,       # (T, B*E)  time-major input, batch packed along lanes
    wqkv_ref,    # (E, 3E)   [wq.T * scaling | wk.T | wv.T]   (pre-transposed)
    bqkv_ref,    # (1, 3E)   [bq * scaling | bk | bv]
    wo_ref,      # (E, E)    wo.T
    w1_ref,      # (E, F)    w1.T  (fc1)
    b1_ref,      # (1, F)
    w2_ref,      # (F, E)    w2.T  (fc2)
    vec_ref,     # (6, E)    rows: bo, ln1_gamma, ln1_beta, b2, ln2_gamma, ln2_beta
    out_ref,     # (T, B*E)
):
    n_batch = x_ref.shape[1] // EMBED_DIM

    # Hoist all (tiny) parameter loads out of the batch loop.
    wqkv = wqkv_ref[...]
    bqkv = bqkv_ref[...]
    wo = wo_ref[...]
    w1 = w1_ref[...]
    b1 = b1_ref[...]
    w2 = w2_ref[...]
    bo = vec_ref[0:1, :]
    g1 = vec_ref[1:2, :]
    be1 = vec_ref[2:3, :]
    b2 = vec_ref[3:4, :]
    g2 = vec_ref[4:5, :]
    be2 = vec_ref[5:6, :]

    for b in range(n_batch):                       # static unroll (B is tiny)
        col = b * EMBED_DIM
        x = x_ref[:, col:col + EMBED_DIM]          # (T, E), static lane slice

        # ---- fused QKV projection (scaling pre-folded into Q part) ----
        qkv = jnp.dot(x, wqkv, preferred_element_type=jnp.float32) + bqkv

        # ---- per-head scaled-dot-product attention with softmax ----
        # Kept as a static per-head loop (robust Mosaic lowering at D=8);
        # a (H,T,D)-batched dot_general would need in-kernel transposes.
        ctx_heads = []
        for h in range(NUM_HEADS):
            lo = h * HEAD_DIM
            qh = qkv[:, lo:lo + HEAD_DIM]                                   # (T, D)
            kh = qkv[:, EMBED_DIM + lo:EMBED_DIM + lo + HEAD_DIM]           # (T, D)
            vh = qkv[:, 2 * EMBED_DIM + lo:2 * EMBED_DIM + lo + HEAD_DIM]   # (T, D)
            s = jnp.dot(qh, kh.T, preferred_element_type=jnp.float32)       # (T, T)
            s = s - jnp.max(s, axis=-1, keepdims=True)
            p = jnp.exp(s)
            p = p * pl.reciprocal(jnp.sum(p, axis=-1, keepdims=True), approx=True)
            ctx_heads.append(jnp.dot(p, vh, preferred_element_type=jnp.float32))
        ctx = jnp.concatenate(ctx_heads, axis=-1)                           # (T, E)

        # ---- output projection ----
        attn_out = jnp.dot(ctx, wo, preferred_element_type=jnp.float32) + bo

        # ---- residual + self_attn_layer_norm (post-LN) ----
        x1 = _layer_norm(x + attn_out, g1, be1)

        # ---- FFN: relu(fc1) -> fc2 ----
        h1 = jnp.maximum(
            jnp.dot(x1, w1, preferred_element_type=jnp.float32) + b1, 0.0)
        ff = jnp.dot(h1, w2, preferred_element_type=jnp.float32) + b2

        # ---- residual + final_layer_norm ----
        out_ref[:, col:col + EMBED_DIM] = _layer_norm(x1 + ff, g2, be2)


def prepare_params(params):
    """One-time, off-hot-path parameter prep: fuse QKV, pre-transpose weights,
    fold in the attention scaling, and pack the small vectors into one operand."""
    (wq, bq, wk, bk, wv, bv, wo, bo,
     g1, beta1, w1, b1, w2, b2, g2, beta2) = params
    w_qkv = jnp.concatenate([wq.T * SCALING, wk.T, wv.T], axis=1)    # (E, 3E)
    b_qkv = jnp.concatenate([bq * SCALING, bk, bv], axis=1)          # (1, 3E)
    vecs = jnp.concatenate([bo, g1, beta1, b2, g2, beta2], axis=0)   # (6, E)
    return (w_qkv, b_qkv, wo.T, w1.T, b1, w2.T, vecs)


@jax.jit
def transformer_encoder_layer(x_tbe, prep):
    """x_tbe: (T, B, E) float32, fairseq time-major layout. Returns (T, B, E)."""
    T, B, E = x_tbe.shape
    w_qkv, b_qkv, wo_t, w1_t, b1, w2_t, vecs = prep

    x_flat = x_tbe.reshape(T, B * E)   # free reshape (contiguous) -- no transpose

    vmem = lambda: pl.BlockSpec(memory_space=pltpu.MemorySpace.VMEM)
    out_flat = pl.pallas_call(
        _encoder_layer_kernel,
        out_shape=jax.ShapeDtypeStruct((T, B * E), jnp.float32),
        in_specs=[vmem() for _ in range(8)],
        out_specs=vmem(),
    )(x_flat, w_qkv, b_qkv, wo_t, w1_t, b1, w2_t, vecs)

    return out_flat.reshape(T, B, E)   # free reshape back


def _reference(x_tbe, params):
    """Pure-JAX reference of the PyTorch forward (post-LN, eval mode)."""
    (wq, bq, wk, bk, wv, bv, wo, bo,
     g1, beta1, w1, b1, w2, b2, g2, beta2) = params
    x = jnp.transpose(x_tbe, (1, 0, 2))       # (B, T, E)
    B, T, E = x.shape

    def ln(y, g, b):
        mu = jnp.mean(y, axis=-1, keepdims=True)
        var = jnp.mean((y - mu) ** 2, axis=-1, keepdims=True)
        return (y - mu) * jax.lax.rsqrt(var + LN_EPS) * g + b

    q = (x @ wq.T + bq) * SCALING
    k = x @ wk.T + bk
    v = x @ wv.T + bv
    qh = q.reshape(B, T, NUM_HEADS, HEAD_DIM).transpose(0, 2, 1, 3)
    kh = k.reshape(B, T, NUM_HEADS, HEAD_DIM).transpose(0, 2, 1, 3)
    vh = v.reshape(B, T, NUM_HEADS, HEAD_DIM).transpose(0, 2, 1, 3)
    scores = jnp.einsum("bhqd,bhkd->bhqk", qh, kh)
    p = jax.nn.softmax(scores, axis=-1)
    ctx = jnp.einsum("bhqk,bhkd->bhqd", p, vh).transpose(0, 2, 1, 3).reshape(B, T, E)
    attn_out = ctx @ wo.T + bo
    x1n = ln(x + attn_out, g1, beta1)
    ff = jnp.maximum(x1n @ w1.T + b1, 0.0) @ w2.T + b2
    out = ln(x1n + ff, g2, beta2)
    return jnp.transpose(out, (1, 0, 2))


def _init_params(key):
    ks = jax.random.split(key, 8)
    scale = 0.05
    wq = scale * jax.random.normal(ks[0], (EMBED_DIM, EMBED_DIM), jnp.float32)
    wk = scale * jax.random.normal(ks[1], (EMBED_DIM, EMBED_DIM), jnp.float32)
    wv = scale * jax.random.normal(ks[2], (EMBED_DIM, EMBED_DIM), jnp.float32)
    wo = scale * jax.random.normal(ks[3], (EMBED_DIM, EMBED_DIM), jnp.float32)
    bq = 0.01 * jax.random.normal(ks[4], (1, EMBED_DIM), jnp.float32)
    bk = jnp.zeros((1, EMBED_DIM), jnp.float32)
    bv = 0.01 * jax.random.normal(ks[5], (1, EMBED_DIM), jnp.float32)
    bo = jnp.zeros((1, EMBED_DIM), jnp.float32)
    g1 = jnp.ones((1, EMBED_DIM), jnp.float32)
    beta1 = jnp.zeros((1, EMBED_DIM), jnp.float32)
    w1 = scale * jax.random.normal(ks[6], (FFN_DIM, EMBED_DIM), jnp.float32)
    b1 = jnp.zeros((1, FFN_DIM), jnp.float32)
    w2 = scale * jax.random.normal(ks[7], (EMBED_DIM, FFN_DIM), jnp.float32)
    b2 = jnp.zeros((1, EMBED_DIM), jnp.float32)
    g2 = jnp.ones((1, EMBED_DIM), jnp.float32)
    beta2 = jnp.zeros((1, EMBED_DIM), jnp.float32)
    return (wq, bq, wk, bk, wv, bv, wo, bo,
            g1, beta1, w1, b1, w2, b2, g2, beta2)


if __name__ == "__main__":
    key = jax.random.PRNGKey(0)
    k_x, k_p = jax.random.split(key)

    T, B = 8, 2                                   # seq_len, batch
    x = jax.random.normal(k_x, (T, B, EMBED_DIM), jnp.float32)   # (T, B, E)
    params = _init_params(k_p)
    prep = prepare_params(params)                 # one-time, off the hot path

    out = transformer_encoder_layer(x, prep)
    out = jax.block_until_ready(out)

    ref = _reference(x, params)
    assert out.shape == (T, B, EMBED_DIM)
    # Tolerance loosened slightly vs f32-exact because of the approximate
    # (EUP) reciprocal in the softmax denominator.
    assert jnp.allclose(out, ref, atol=2e-3, rtol=2e-3), (
        float(jnp.max(jnp.abs(out - ref))))

    print("KERNEL_OK")
</pallas_src>

<mosaic_0001>
module attributes {stable_mosaic.version = 11 : i64} {
  func.func @_encoder_layer_kernel(%arg0: memref<8x64xf32, #tpu.memory_space<vmem>>, %arg1: memref<32x96xf32, #tpu.memory_space<vmem>>, %arg2: memref<1x96xf32, #tpu.memory_space<vmem>>, %arg3: memref<32x32xf32, #tpu.memory_space<vmem>>, %arg4: memref<32x64xf32, #tpu.memory_space<vmem>>, %arg5: memref<1x64xf32, #tpu.memory_space<vmem>>, %arg6: memref<64x32xf32, #tpu.memory_space<vmem>>, %arg7: memref<6x32xf32, #tpu.memory_space<vmem>>, %arg8: memref<8x64xf32, #tpu.memory_space<vmem>>) attributes {dimension_semantics = [], scalar_prefetch = 0 : i64, scratch_operands = 0 : i64, tpu.core_type = #tpu.core_type<tc>} {
    %c0 = arith.constant 0 : index
    %c0_0 = arith.constant 0 : index
    %0 = vector.load %arg1[%c0, %c0_0] : memref<32x96xf32, #tpu.memory_space<vmem>>, vector<32x96xf32>
    %c0_1 = arith.constant 0 : index
    %c0_2 = arith.constant 0 : index
    %1 = vector.load %arg2[%c0_1, %c0_2] : memref<1x96xf32, #tpu.memory_space<vmem>>, vector<1x96xf32>
    %c0_3 = arith.constant 0 : index
    %c0_4 = arith.constant 0 : index
    %2 = vector.load %arg3[%c0_3, %c0_4] : memref<32x32xf32, #tpu.memory_space<vmem>>, vector<32x32xf32>
    %c0_5 = arith.constant 0 : index
    %c0_6 = arith.constant 0 : index
    %3 = vector.load %arg4[%c0_5, %c0_6] : memref<32x64xf32, #tpu.memory_space<vmem>>, vector<32x64xf32>
    %c0_7 = arith.constant 0 : index
    %c0_8 = arith.constant 0 : index
    %4 = vector.load %arg5[%c0_7, %c0_8] : memref<1x64xf32, #tpu.memory_space<vmem>>, vector<1x64xf32>
    %c0_9 = arith.constant 0 : index
    %c0_10 = arith.constant 0 : index
    %5 = vector.load %arg6[%c0_9, %c0_10] : memref<64x32xf32, #tpu.memory_space<vmem>>, vector<64x32xf32>
    %c0_11 = arith.constant 0 : index
    %c0_12 = arith.constant 0 : index
    %6 = vector.load %arg7[%c0_11, %c0_12] : memref<6x32xf32, #tpu.memory_space<vmem>>, vector<1x32xf32>
    %c1 = arith.constant 1 : index
    %c0_13 = arith.constant 0 : index
    %7 = vector.load %arg7[%c1, %c0_13] : memref<6x32xf32, #tpu.memory_space<vmem>>, vector<1x32xf32>
    %c2 = arith.constant 2 : index
    %c0_14 = arith.constant 0 : index
    %8 = vector.load %arg7[%c2, %c0_14] : memref<6x32xf32, #tpu.memory_space<vmem>>, vector<1x32xf32>
    %c3 = arith.constant 3 : index
    %c0_15 = arith.constant 0 : index
    %9 = vector.load %arg7[%c3, %c0_15] : memref<6x32xf32, #tpu.memory_space<vmem>>, vector<1x32xf32>
    %c4 = arith.constant 4 : index
    %c0_16 = arith.constant 0 : index
    %10 = vector.load %arg7[%c4, %c0_16] : memref<6x32xf32, #tpu.memory_space<vmem>>, vector<1x32xf32>
    %c5 = arith.constant 5 : index
    %c0_17 = arith.constant 0 : index
    %11 = vector.load %arg7[%c5, %c0_17] : memref<6x32xf32, #tpu.memory_space<vmem>>, vector<1x32xf32>
    %c0_18 = arith.constant 0 : index
    %c0_19 = arith.constant 0 : index
    %12 = vector.load %arg0[%c0_18, %c0_19] : memref<8x64xf32, #tpu.memory_space<vmem>>, vector<8x32xf32>
    %cst = arith.constant dense<0.000000e+00> : vector<8x96xf32>
    %13 = tpu.matmul %12, %0, %cst {dimension_numbers = #tpu.dot_dimension_numbers<[1], [0], [0], [1], [0, 0, 1, 1], [], []>} : vector<8x32xf32>, vector<32x96xf32>, vector<8x96xf32> -> vector<8x96xf32>
    %14 = vector.broadcast %1 : vector<1x96xf32> to vector<8x96xf32>
    %15 = arith.addf %13, %14 : vector<8x96xf32>
    %16 = vector.extract_strided_slice %15 {offsets = [0, 0], sizes = [8, 8], strides = [1, 1]} : vector<8x96xf32> to vector<8x8xf32>
    %17 = vector.extract_strided_slice %15 {offsets = [0, 32], sizes = [8, 8], strides = [1, 1]} : vector<8x96xf32> to vector<8x8xf32>
    %18 = vector.extract_strided_slice %15 {offsets = [0, 64], sizes = [8, 8], strides = [1, 1]} : vector<8x96xf32> to vector<8x8xf32>
    %19 = tpu.transpose %17, [1, 0] : vector<8x8xf32> -> vector<8x8xf32>
    %cst_20 = arith.constant dense<0.000000e+00> : vector<8x8xf32>
    %20 = tpu.matmul %16, %19, %cst_20 {dimension_numbers = #tpu.dot_dimension_numbers<[1], [0], [0], [1], [0, 0, 1, 1], [], []>} : vector<8x8xf32>, vector<8x8xf32>, vector<8x8xf32> -> vector<8x8xf32>
    %cst_21 = arith.constant dense<0xFF800000> : vector<8xf32>
    %21 = vector.multi_reduction <maximumf>, %20, %cst_21 [1] : vector<8x8xf32> to vector<8xf32>
    %22 = vector.shape_cast %21 : vector<8xf32> to vector<8x1xf32>
    %23 = vector.broadcast %22 : vector<8x1xf32> to vector<8x8xf32>
    %24 = arith.subf %20, %23 : vector<8x8xf32>
    %25 = math.exp %24 : vector<8x8xf32>
    %cst_22 = arith.constant dense<0.000000e+00> : vector<8xf32>
    %26 = vector.multi_reduction <add>, %25, %cst_22 [1] : vector<8x8xf32> to vector<8xf32>
    %27 = vector.shape_cast %26 : vector<8xf32> to vector<8x1xf32>
    %28 = tpu.reciprocal %27 {approx = true} : vector<8x1xf32> -> vector<8x1xf32>
    %29 = vector.broadcast %28 : vector<8x1xf32> to vector<8x8xf32>
    %30 = arith.mulf %25, %29 : vector<8x8xf32>
    %cst_23 = arith.constant dense<0.000000e+00> : vector<8x8xf32>
    %31 = tpu.matmul %30, %18, %cst_23 {dimension_numbers = #tpu.dot_dimension_numbers<[1], [0], [0], [1], [0, 0, 1, 1], [], []>} : vector<8x8xf32>, vector<8x8xf32>, vector<8x8xf32> -> vector<8x8xf32>
    %32 = vector.extract_strided_slice %15 {offsets = [0, 8], sizes = [8, 8], strides = [1, 1]} : vector<8x96xf32> to vector<8x8xf32>
    %33 = vector.extract_strided_slice %15 {offsets = [0, 40], sizes = [8, 8], strides = [1, 1]} : vector<8x96xf32> to vector<8x8xf32>
    %34 = vector.extract_strided_slice %15 {offsets = [0, 72], sizes = [8, 8], strides = [1, 1]} : vector<8x96xf32> to vector<8x8xf32>
    %35 = tpu.transpose %33, [1, 0] : vector<8x8xf32> -> vector<8x8xf32>
    %cst_24 = arith.constant dense<0.000000e+00> : vector<8x8xf32>
    %36 = tpu.matmul %32, %35, %cst_24 {dimension_numbers = #tpu.dot_dimension_numbers<[1], [0], [0], [1], [0, 0, 1, 1], [], []>} : vector<8x8xf32>, vector<8x8xf32>, vector<8x8xf32> -> vector<8x8xf32>
    %cst_25 = arith.constant dense<0xFF800000> : vector<8xf32>
    %37 = vector.multi_reduction <maximumf>, %36, %cst_25 [1] : vector<8x8xf32> to vector<8xf32>
    %38 = vector.shape_cast %37 : vector<8xf32> to vector<8x1xf32>
    %39 = vector.broadcast %38 : vector<8x1xf32> to vector<8x8xf32>
    %40 = arith.subf %36, %39 : vector<8x8xf32>
    %41 = math.exp %40 : vector<8x8xf32>
    %cst_26 = arith.constant dense<0.000000e+00> : vector<8xf32>
    %42 = vector.multi_reduction <add>, %41, %cst_26 [1] : vector<8x8xf32> to vector<8xf32>
    %43 = vector.shape_cast %42 : vector<8xf32> to vector<8x1xf32>
    %44 = tpu.reciprocal %43 {approx = true} : vector<8x1xf32> -> vector<8x1xf32>
    %45 = vector.broadcast %44 : vector<8x1xf32> to vector<8x8xf32>
    %46 = arith.mulf %41, %45 : vector<8x8xf32>
    %cst_27 = arith.constant dense<0.000000e+00> : vector<8x8xf32>
    %47 = tpu.matmul %46, %34, %cst_27 {dimension_numbers = #tpu.dot_dimension_numbers<[1], [0], [0], [1], [0, 0, 1, 1], [], []>} : vector<8x8xf32>, vector<8x8xf32>, vector<8x8xf32> -> vector<8x8xf32>
    %48 = vector.extract_strided_slice %15 {offsets = [0, 16], sizes = [8, 8], strides = [1, 1]} : vector<8x96xf32> to vector<8x8xf32>
    %49 = vector.extract_strided_slice %15 {offsets = [0, 48], sizes = [8, 8], strides = [1, 1]} : vector<8x96xf32> to vector<8x8xf32>
    %50 = vector.extract_strided_slice %15 {offsets = [0, 80], sizes = [8, 8], strides = [1, 1]} : vector<8x96xf32> to vector<8x8xf32>
    %51 = tpu.transpose %49, [1, 0] : vector<8x8xf32> -> vector<8x8xf32>
    %cst_28 = arith.constant dense<0.000000e+00> : vector<8x8xf32>
    %52 = tpu.matmul %48, %51, %cst_28 {dimension_numbers = #tpu.dot_dimension_numbers<[1], [0], [0], [1], [0, 0, 1, 1], [], []>} : vector<8x8xf32>, vector<8x8xf32>, vector<8x8xf32> -> vector<8x8xf32>
    %cst_29 = arith.constant dense<0xFF800000> : vector<8xf32>
    %53 = vector.multi_reduction <maximumf>, %52, %cst_29 [1] : vector<8x8xf32> to vector<8xf32>
    %54 = vector.shape_cast %53 : vector<8xf32> to vector<8x1xf32>
    %55 = vector.broadcast %54 : vector<8x1xf32> to vector<8x8xf32>
    %56 = arith.subf %52, %55 : vector<8x8xf32>
    %57 = math.exp %56 : vector<8x8xf32>
    %cst_30 = arith.constant dense<0.000000e+00> : vector<8xf32>
    %58 = vector.multi_reduction <add>, %57, %cst_30 [1] : vector<8x8xf32> to vector<8xf32>
    %59 = vector.shape_cast %58 : vector<8xf32> to vector<8x1xf32>
    %60 = tpu.reciprocal %59 {approx = true} : vector<8x1xf32> -> vector<8x1xf32>
    %61 = vector.broadcast %60 : vector<8x1xf32> to vector<8x8xf32>
    %62 = arith.mulf %57, %61 : vector<8x8xf32>
    %cst_31 = arith.constant dense<0.000000e+00> : vector<8x8xf32>
    %63 = tpu.matmul %62, %50, %cst_31 {dimension_numbers = #tpu.dot_dimension_numbers<[1], [0], [0], [1], [0, 0, 1, 1], [], []>} : vector<8x8xf32>, vector<8x8xf32>, vector<8x8xf32> -> vector<8x8xf32>
    %64 = vector.extract_strided_slice %15 {offsets = [0, 24], sizes = [8, 8], strides = [1, 1]} : vector<8x96xf32> to vector<8x8xf32>
    %65 = vector.extract_strided_slice %15 {offsets = [0, 56], sizes = [8, 8], strides = [1, 1]} : vector<8x96xf32> to vector<8x8xf32>
    %66 = vector.extract_strided_slice %15 {offsets = [0, 88], sizes = [8, 8], strides = [1, 1]} : vector<8x96xf32> to vector<8x8xf32>
    %67 = tpu.transpose %65, [1, 0] : vector<8x8xf32> -> vector<8x8xf32>
    %cst_32 = arith.constant dense<0.000000e+00> : vector<8x8xf32>
    %68 = tpu.matmul %64, %67, %cst_32 {dimension_numbers = #tpu.dot_dimension_numbers<[1], [0], [0], [1], [0, 0, 1, 1], [], []>} : vector<8x8xf32>, vector<8x8xf32>, vector<8x8xf32> -> vector<8x8xf32>
    %cst_33 = arith.constant dense<0xFF800000> : vector<8xf32>
    %69 = vector.multi_reduction <maximumf>, %68, %cst_33 [1] : vector<8x8xf32> to vector<8xf32>
    %70 = vector.shape_cast %69 : vector<8xf32> to vector<8x1xf32>
    %71 = vector.broadcast %70 : vector<8x1xf32> to vector<8x8xf32>
    %72 = arith.subf %68, %71 : vector<8x8xf32>
    %73 = math.exp %72 : vector<8x8xf32>
    %cst_34 = arith.constant dense<0.000000e+00> : vector<8xf32>
    %74 = vector.multi_reduction <add>, %73, %cst_34 [1] : vector<8x8xf32> to vector<8xf32>
    %75 = vector.shape_cast %74 : vector<8xf32> to vector<8x1xf32>
    %76 = tpu.reciprocal %75 {approx = true} : vector<8x1xf32> -> vector<8x1xf32>
    %77 = vector.broadcast %76 : vector<8x1xf32> to vector<8x8xf32>
    %78 = arith.mulf %73, %77 : vector<8x8xf32>
    %cst_35 = arith.constant dense<0.000000e+00> : vector<8x8xf32>
    %79 = tpu.matmul %78, %66, %cst_35 {dimension_numbers = #tpu.dot_dimension_numbers<[1], [0], [0], [1], [0, 0, 1, 1], [], []>} : vector<8x8xf32>, vector<8x8xf32>, vector<8x8xf32> -> vector<8x8xf32>
    %80 = tpu.concatenate %31, %47, %63, %79 in 1 : vector<8x8xf32>, vector<8x8xf32>, vector<8x8xf32>, vector<8x8xf32> -> vector<8x32xf32>
    %cst_36 = arith.constant dense<0.000000e+00> : vector<8x32xf32>
    %81 = tpu.matmul %80, %2, %cst_36 {dimension_numbers = #tpu.dot_dimension_numbers<[1], [0], [0], [1], [0, 0, 1, 1], [], []>} : vector<8x32xf32>, vector<32x32xf32>, vector<8x32xf32> -> vector<8x32xf32>
    %82 = vector.broadcast %6 : vector<1x32xf32> to vector<8x32xf32>
    %83 = arith.addf %81, %82 : vector<8x32xf32>
    %84 = arith.addf %12, %83 : vector<8x32xf32>
    %cst_37 = arith.constant dense<0.000000e+00> : vector<8xf32>
    %85 = vector.multi_reduction <add>, %84, %cst_37 [1] : vector<8x32xf32> to vector<8xf32>
    %86 = vector.shape_cast %85 : vector<8xf32> to vector<8x1xf32>
    %cst_38 = arith.constant 3.200000e+01 : f32
    %87 = vector.broadcast %cst_38 : f32 to vector<8x1xf32>
    %88 = arith.divf %86, %87 : vector<8x1xf32>
    %89 = vector.broadcast %88 : vector<8x1xf32> to vector<8x32xf32>
    %90 = arith.subf %84, %89 : vector<8x32xf32>
    %91 = arith.mulf %90, %90 : vector<8x32xf32>
    %cst_39 = arith.constant dense<0.000000e+00> : vector<8xf32>
    %92 = vector.multi_reduction <add>, %91, %cst_39 [1] : vector<8x32xf32> to vector<8xf32>
    %93 = vector.shape_cast %92 : vector<8xf32> to vector<8x1xf32>
    %cst_40 = arith.constant 3.200000e+01 : f32
    %94 = vector.broadcast %cst_40 : f32 to vector<8x1xf32>
    %95 = arith.divf %93, %94 : vector<8x1xf32>
    %96 = vector.broadcast %88 : vector<8x1xf32> to vector<8x32xf32>
    %97 = arith.subf %84, %96 : vector<8x32xf32>
    %cst_41 = arith.constant 9.99999974E-6 : f32
    %98 = vector.broadcast %cst_41 : f32 to vector<8x1xf32>
    %99 = arith.addf %95, %98 : vector<8x1xf32>
    %100 = math.rsqrt %99 : vector<8x1xf32>
    %101 = vector.broadcast %100 : vector<8x1xf32> to vector<8x32xf32>
    %102 = arith.mulf %97, %101 : vector<8x32xf32>
    %103 = vector.broadcast %7 : vector<1x32xf32> to vector<8x32xf32>
    %104 = arith.mulf %102, %103 : vector<8x32xf32>
    %105 = vector.broadcast %8 : vector<1x32xf32> to vector<8x32xf32>
    %106 = arith.addf %104, %105 : vector<8x32xf32>
    %cst_42 = arith.constant dense<0.000000e+00> : vector<8x64xf32>
    %107 = tpu.matmul %106, %3, %cst_42 {dimension_numbers = #tpu.dot_dimension_numbers<[1], [0], [0], [1], [0, 0, 1, 1], [], []>} : vector<8x32xf32>, vector<32x64xf32>, vector<8x64xf32> -> vector<8x64xf32>
    %108 = vector.broadcast %4 : vector<1x64xf32> to vector<8x64xf32>
    %109 = arith.addf %107, %108 : vector<8x64xf32>
    %cst_43 = arith.constant 0.000000e+00 : f32
    %110 = vector.broadcast %cst_43 : f32 to vector<8x64xf32>
    %111 = arith.maximumf %109, %110 : vector<8x64xf32>
    %cst_44 = arith.constant dense<0.000000e+00> : vector<8x32xf32>
    %112 = tpu.matmul %111, %5, %cst_44 {dimension_numbers = #tpu.dot_dimension_numbers<[1], [0], [0], [1], [0, 0, 1, 1], [], []>} : vector<8x64xf32>, vector<64x32xf32>, vector<8x32xf32> -> vector<8x32xf32>
    %113 = vector.broadcast %9 : vector<1x32xf32> to vector<8x32xf32>
    %114 = arith.addf %112, %113 : vector<8x32xf32>
    %115 = arith.addf %106, %114 : vector<8x32xf32>
    %cst_45 = arith.constant dense<0.000000e+00> : vector<8xf32>
    %116 = vector.multi_reduction <add>, %115, %cst_45 [1] : vector<8x32xf32> to vector<8xf32>
    %117 = vector.shape_cast %116 : vector<8xf32> to vector<8x1xf32>
    %cst_46 = arith.constant 3.200000e+01 : f32
    %118 = vector.broadcast %cst_46 : f32 to vector<8x1xf32>
    %119 = arith.divf %117, %118 : vector<8x1xf32>
    %120 = vector.broadcast %119 : vector<8x1xf32> to vector<8x32xf32>
    %121 = arith.subf %115, %120 : vector<8x32xf32>
    %122 = arith.mulf %121, %121 : vector<8x32xf32>
    %cst_47 = arith.constant dense<0.000000e+00> : vector<8xf32>
    %123 = vector.multi_reduction <add>, %122, %cst_47 [1] : vector<8x32xf32> to vector<8xf32>
    %124 = vector.shape_cast %123 : vector<8xf32> to vector<8x1xf32>
    %cst_48 = arith.constant 3.200000e+01 : f32
    %125 = vector.broadcast %cst_48 : f32 to vector<8x1xf32>
    %126 = arith.divf %124, %125 : vector<8x1xf32>
    %127 = vector.broadcast %119 : vector<8x1xf32> to vector<8x32xf32>
    %128 = arith.subf %115, %127 : vector<8x32xf32>
    %cst_49 = arith.constant 9.99999974E-6 : f32
    %129 = vector.broadcast %cst_49 : f32 to vector<8x1xf32>
    %130 = arith.addf %126, %129 : vector<8x1xf32>
    %131 = math.rsqrt %130 : vector<8x1xf32>
    %132 = vector.broadcast %131 : vector<8x1xf32> to vector<8x32xf32>
    %133 = arith.mulf %128, %132 : vector<8x32xf32>
    %134 = vector.broadcast %10 : vector<1x32xf32> to vector<8x32xf32>
    %135 = arith.mulf %133, %134 : vector<8x32xf32>
    %136 = vector.broadcast %11 : vector<1x32xf32> to vector<8x32xf32>
    %137 = arith.addf %135, %136 : vector<8x32xf32>
    %c0_50 = arith.constant 0 : index
    %c0_51 = arith.constant 0 : index
    %138 = vector.load %arg8[%c0_50, %c0_51] : memref<8x64xf32, #tpu.memory_space<vmem>>, vector<8x32xf32>
    tpu.vector_store %arg8[%c0_50, %c0_51], %137 {strides = array<i32>} : memref<8x64xf32, #tpu.memory_space<vmem>>, vector<8x32xf32>,
    %c0_52 = arith.constant 0 : index
    %c32 = arith.constant 32 : index
    %139 = vector.load %arg0[%c0_52, %c32] : memref<8x64xf32, #tpu.memory_space<vmem>>, vector<8x32xf32>
    %cst_53 = arith.constant dense<0.000000e+00> : vector<8x96xf32>
    %140 = tpu.matmul %139, %0, %cst_53 {dimension_numbers = #tpu.dot_dimension_numbers<[1], [0], [0], [1], [0, 0, 1, 1], [], []>} : vector<8x32xf32>, vector<32x96xf32>, vector<8x96xf32> -> vector<8x96xf32>
    %141 = vector.broadcast %1 : vector<1x96xf32> to vector<8x96xf32>
    %142 = arith.addf %140, %141 : vector<8x96xf32>
    %143 = vector.extract_strided_slice %142 {offsets = [0, 0], sizes = [8, 8], strides = [1, 1]} : vector<8x96xf32> to vector<8x8xf32>
    %144 = vector.extract_strided_slice %142 {offsets = [0, 32], sizes = [8, 8], strides = [1, 1]} : vector<8x96xf32> to vector<8x8xf32>
    %145 = vector.extract_strided_slice %142 {offsets = [0, 64], sizes = [8, 8], strides = [1, 1]} : vector<8x96xf32> to vector<8x8xf32>
    %146 = tpu.transpose %144, [1, 0] : vector<8x8xf32> -> vector<8x8xf32>
    %cst_54 = arith.constant dense<0.000000e+00> : vector<8x8xf32>
    %147 = tpu.matmul %143, %146, %cst_54 {dimension_numbers = #tpu.dot_dimension_numbers<[1], [0], [0], [1], [0, 0, 1, 1], [], []>} : vector<8x8xf32>, vector<8x8xf32>, vector<8x8xf32> -> vector<8x8xf32>
    %cst_55 = arith.constant dense<0xFF800000> : vector<8xf32>
    %148 = vector.multi_reduction <maximumf>, %147, %cst_55 [1] : vector<8x8xf32> to vector<8xf32>
    %149 = vector.shape_cast %148 : vector<8xf32> to vector<8x1xf32>
    %150 = vector.broadcast %149 : vector<8x1xf32> to vector<8x8xf32>
    %151 = arith.subf %147, %150 : vector<8x8xf32>
    %152 = math.exp %151 : vector<8x8xf32>
    %cst_56 = arith.constant dense<0.000000e+00> : vector<8xf32>
    %153 = vector.multi_reduction <add>, %152, %cst_56 [1] : vector<8x8xf32> to vector<8xf32>
    %154 = vector.shape_cast %153 : vector<8xf32> to vector<8x1xf32>
    %155 = tpu.reciprocal %154 {approx = true} : vector<8x1xf32> -> vector<8x1xf32>
    %156 = vector.broadcast %155 : vector<8x1xf32> to vector<8x8xf32>
    %157 = arith.mulf %152, %156 : vector<8x8xf32>
    %cst_57 = arith.constant dense<0.000000e+00> : vector<8x8xf32>
    %158 = tpu.matmul %157, %145, %cst_57 {dimension_numbers = #tpu.dot_dimension_numbers<[1], [0], [0], [1], [0, 0, 1, 1], [], []>} : vector<8x8xf32>, vector<8x8xf32>, vector<8x8xf32> -> vector<8x8xf32>
    %159 = vector.extract_strided_slice %142 {offsets = [0, 8], sizes = [8, 8], strides = [1, 1]} : vector<8x96xf32> to vector<8x8xf32>
    %160 = vector.extract_strided_slice %142 {offsets = [0, 40], sizes = [8, 8], strides = [1, 1]} : vector<8x96xf32> to vector<8x8xf32>
    %161 = vector.extract_strided_slice %142 {offsets = [0, 72], sizes = [8, 8], strides = [1, 1]} : vector<8x96xf32> to vector<8x8xf32>
    %162 = tpu.transpose %160, [1, 0] : vector<8x8xf32> -> vector<8x8xf32>
    %cst_58 = arith.constant dense<0.000000e+00> : vector<8x8xf32>
    %163 = tpu.matmul %159, %162, %cst_58 {dimension_numbers = #tpu.dot_dimension_numbers<[1], [0], [0], [1], [0, 0, 1, 1], [], []>} : vector<8x8xf32>, vector<8x8xf32>, vector<8x8xf32> -> vector<8x8xf32>
    %cst_59 = arith.constant dense<0xFF800000> : vector<8xf32>
    %164 = vector.multi_reduction <maximumf>, %163, %cst_59 [1] : vector<8x8xf32> to vector<8xf32>
    %165 = vector.shape_cast %164 : vector<8xf32> to vector<8x1xf32>
    %166 = vector.broadcast %165 : vector<8x1xf32> to vector<8x8xf32>
    %167 = arith.subf %163, %166 : vector<8x8xf32>
    %168 = math.exp %167 : vector<8x8xf32>
    %cst_60 = arith.constant dense<0.000000e+00> : vector<8xf32>
    %169 = vector.multi_reduction <add>, %168, %cst_60 [1] : vector<8x8xf32> to vector<8xf32>
    %170 = vector.shape_cast %169 : vector<8xf32> to vector<8x1xf32>
    %171 = tpu.reciprocal %170 {approx = true} : vector<8x1xf32> -> vector<8x1xf32>
    %172 = vector.broadcast %171 : vector<8x1xf32> to vector<8x8xf32>
    %173 = arith.mulf %168, %172 : vector<8x8xf32>
    %cst_61 = arith.constant dense<0.000000e+00> : vector<8x8xf32>
    %174 = tpu.matmul %173, %161, %cst_61 {dimension_numbers = #tpu.dot_dimension_numbers<[1], [0], [0], [1], [0, 0, 1, 1], [], []>} : vector<8x8xf32>, vector<8x8xf32>, vector<8x8xf32> -> vector<8x8xf32>
    %175 = vector.extract_strided_slice %142 {offsets = [0, 16], sizes = [8, 8], strides = [1, 1]} : vector<8x96xf32> to vector<8x8xf32>
    %176 = vector.extract_strided_slice %142 {offsets = [0, 48], sizes = [8, 8], strides = [1, 1]} : vector<8x96xf32> to vector<8x8xf32>
    %177 = vector.extract_strided_slice %142 {offsets = [0, 80], sizes = [8, 8], strides = [1, 1]} : vector<8x96xf32> to vector<8x8xf32>
    %178 = tpu.transpose %176, [1, 0] : vector<8x8xf32> -> vector<8x8xf32>
    %cst_62 = arith.constant dense<0.000000e+00> : vector<8x8xf32>
    %179 = tpu.matmul %175, %178, %cst_62 {dimension_numbers = #tpu.dot_dimension_numbers<[1], [0], [0], [1], [0, 0, 1, 1], [], []>} : vector<8x8xf32>, vector<8x8xf32>, vector<8x8xf32> -> vector<8x8xf32>
    %cst_63 = arith.constant dense<0xFF800000> : vector<8xf32>
    %180 = vector.multi_reduction <maximumf>, %179, %cst_63 [1] : vector<8x8xf32> to vector<8xf32>
    %181 = vector.shape_cast %180 : vector<8xf32> to vector<8x1xf32>
    %182 = vector.broadcast %181 : vector<8x1xf32> to vector<8x8xf32>
    %183 = arith.subf %179, %182 : vector<8x8xf32>
    %184 = math.exp %183 : vector<8x8xf32>
    %cst_64 = arith.constant dense<0.000000e+00> : vector<8xf32>
    %185 = vector.multi_reduction <add>, %184, %cst_64 [1] : vector<8x8xf32> to vector<8xf32>
    %186 = vector.shape_cast %185 : vector<8xf32> to vector<8x1xf32>
    %187 = tpu.reciprocal %186 {approx = true} : vector<8x1xf32> -> vector<8x1xf32>
    %188 = vector.broadcast %187 : vector<8x1xf32> to vector<8x8xf32>
    %189 = arith.mulf %184, %188 : vector<8x8xf32>
    %cst_65 = arith.constant dense<0.000000e+00> : vector<8x8xf32>
    %190 = tpu.matmul %189, %177, %cst_65 {dimension_numbers = #tpu.dot_dimension_numbers<[1], [0], [0], [1], [0, 0, 1, 1], [], []>} : vector<8x8xf32>, vector<8x8xf32>, vector<8x8xf32> -> vector<8x8xf32>
    %191 = vector.extract_strided_slice %142 {offsets = [0, 24], sizes = [8, 8], strides = [1, 1]} : vector<8x96xf32> to vector<8x8xf32>
    %192 = vector.extract_strided_slice %142 {offsets = [0, 56], sizes = [8, 8], strides = [1, 1]} : vector<8x96xf32> to vector<8x8xf32>
    %193 = vector.extract_strided_slice %142 {offsets = [0, 88], sizes = [8, 8], strides = [1, 1]} : vector<8x96xf32> to vector<8x8xf32>
    %194 = tpu.transpose %192, [1, 0] : vector<8x8xf32> -> vector<8x8xf32>
    %cst_66 = arith.constant dense<0.000000e+00> : vector<8x8xf32>
    %195 = tpu.matmul %191, %194, %cst_66 {dimension_numbers = #tpu.dot_dimension_numbers<[1], [0], [0], [1], [0, 0, 1, 1], [], []>} : vector<8x8xf32>, vector<8x8xf32>, vector<8x8xf32> -> vector<8x8xf32>
    %cst_67 = arith.constant dense<0xFF800000> : vector<8xf32>
    %196 = vector.multi_reduction <maximumf>, %195, %cst_67 [1] : vector<8x8xf32> to vector<8xf32>
    %197 = vector.shape_cast %196 : vector<8xf32> to vector<8x1xf32>
    %198 = vector.broadcast %197 : vector<8x1xf32> to vector<8x8xf32>
    %199 = arith.subf %195, %198 : vector<8x8xf32>
    %200 = math.exp %199 : vector<8x8xf32>
    %cst_68 = arith.constant dense<0.000000e+00> : vector<8xf32>
    %201 = vector.multi_reduction <add>, %200, %cst_68 [1] : vector<8x8xf32> to vector<8xf32>
    %202 = vector.shape_cast %201 : vector<8xf32> to vector<8x1xf32>
    %203 = tpu.reciprocal %202 {approx = true} : vector<8x1xf32> -> vector<8x1xf32>
    %204 = vector.broadcast %203 : vector<8x1xf32> to vector<8x8xf32>
    %205 = arith.mulf %200, %204 : vector<8x8xf32>
    %cst_69 = arith.constant dense<0.000000e+00> : vector<8x8xf32>
    %206 = tpu.matmul %205, %193, %cst_69 {dimension_numbers = #tpu.dot_dimension_numbers<[1], [0], [0], [1], [0, 0, 1, 1], [], []>} : vector<8x8xf32>, vector<8x8xf32>, vector<8x8xf32> -> vector<8x8xf32>
    %207 = tpu.concatenate %158, %174, %190, %206 in 1 : vector<8x8xf32>, vector<8x8xf32>, vector<8x8xf32>, vector<8x8xf32> -> vector<8x32xf32>
    %cst_70 = arith.constant dense<0.000000e+00> : vector<8x32xf32>
    %208 = tpu.matmul %207, %2, %cst_70 {dimension_numbers = #tpu.dot_dimension_numbers<[1], [0], [0], [1], [0, 0, 1, 1], [], []>} : vector<8x32xf32>, vector<32x32xf32>, vector<8x32xf32> -> vector<8x32xf32>
    %209 = vector.broadcast %6 : vector<1x32xf32> to vector<8x32xf32>
    %210 = arith.addf %208, %209 : vector<8x32xf32>
    %211 = arith.addf %139, %210 : vector<8x32xf32>
    %cst_71 = arith.constant dense<0.000000e+00> : vector<8xf32>
    %212 = vector.multi_reduction <add>, %211, %cst_71 [1] : vector<8x32xf32> to vector<8xf32>
    %213 = vector.shape_cast %212 : vector<8xf32> to vector<8x1xf32>
    %cst_72 = arith.constant 3.200000e+01 : f32
    %214 = vector.broadcast %cst_72 : f32 to vector<8x1xf32>
    %215 = arith.divf %213, %214 : vector<8x1xf32>
    %216 = vector.broadcast %215 : vector<8x1xf32> to vector<8x32xf32>
    %217 = arith.subf %211, %216 : vector<8x32xf32>
    %218 = arith.mulf %217, %217 : vector<8x32xf32>
    %cst_73 = arith.constant dense<0.000000e+00> : vector<8xf32>
    %219 = vector.multi_reduction <add>, %218, %cst_73 [1] : vector<8x32xf32> to vector<8xf32>
    %220 = vector.shape_cast %219 : vector<8xf32> to vector<8x1xf32>
    %cst_74 = arith.constant 3.200000e+01 : f32
    %221 = vector.broadcast %cst_74 : f32 to vector<8x1xf32>
    %222 = arith.divf %220, %221 : vector<8x1xf32>
    %223 = vector.broadcast %215 : vector<8x1xf32> to vector<8x32xf32>
    %224 = arith.subf %211, %223 : vector<8x32xf32>
    %cst_75 = arith.constant 9.99999974E-6 : f32
    %225 = vector.broadcast %cst_75 : f32 to vector<8x1xf32>
    %226 = arith.addf %222, %225 : vector<8x1xf32>
    %227 = math.rsqrt %226 : vector<8x1xf32>
    %228 = vector.broadcast %227 : vector<8x1xf32> to vector<8x32xf32>
    %229 = arith.mulf %224, %228 : vector<8x32xf32>
    %230 = vector.broadcast %7 : vector<1x32xf32> to vector<8x32xf32>
    %231 = arith.mulf %229, %230 : vector<8x32xf32>
    %232 = vector.broadcast %8 : vector<1x32xf32> to vector<8x32xf32>
    %233 = arith.addf %231, %232 : vector<8x32xf32>
    %cst_76 = arith.constant dense<0.000000e+00> : vector<8x64xf32>
    %234 = tpu.matmul %233, %3, %cst_76 {dimension_numbers = #tpu.dot_dimension_numbers<[1], [0], [0], [1], [0, 0, 1, 1], [], []>} : vector<8x32xf32>, vector<32x64xf32>, vector<8x64xf32> -> vector<8x64xf32>
    %235 = vector.broadcast %4 : vector<1x64xf32> to vector<8x64xf32>
    %236 = arith.addf %234, %235 : vector<8x64xf32>
    %cst_77 = arith.constant 0.000000e+00 : f32
    %237 = vector.broadcast %cst_77 : f32 to vector<8x64xf32>
    %238 = arith.maximumf %236, %237 : vector<8x64xf32>
    %cst_78 = arith.constant dense<0.000000e+00> : vector<8x32xf32>
    %239 = tpu.matmul %238, %5, %cst_78 {dimension_numbers = #tpu.dot_dimension_numbers<[1], [0], [0], [1], [0, 0, 1, 1], [], []>} : vector<8x64xf32>, vector<64x32xf32>, vector<8x32xf32> -> vector<8x32xf32>
    %240 = vector.broadcast %9 : vector<1x32xf32> to vector<8x32xf32>
    %241 = arith.addf %239, %240 : vector<8x32xf32>
    %242 = arith.addf %233, %241 : vector<8x32xf32>
    %cst_79 = arith.constant dense<0.000000e+00> : vector<8xf32>
    %243 = vector.multi_reduction <add>, %242, %cst_79 [1] : vector<8x32xf32> to vector<8xf32>
    %244 = vector.shape_cast %243 : vector<8xf32> to vector<8x1xf32>
    %cst_80 = arith.constant 3.200000e+01 : f32
    %245 = vector.broadcast %cst_80 : f32 to vector<8x1xf32>
    %246 = arith.divf %244, %245 : vector<8x1xf32>
    %247 = vector.broadcast %246 : vector<8x1xf32> to vector<8x32xf32>
    %248 = arith.subf %242, %247 : vector<8x32xf32>
    %249 = arith.mulf %248, %248 : vector<8x32xf32>
    %cst_81 = arith.constant dense<0.000000e+00> : vector<8xf32>
    %250 = vector.multi_reduction <add>, %249, %cst_81 [1] : vector<8x32xf32> to vector<8xf32>
    %251 = vector.shape_cast %250 : vector<8xf32> to vector<8x1xf32>
    %cst_82 = arith.constant 3.200000e+01 : f32
    %252 = vector.broadcast %cst_82 : f32 to vector<8x1xf32>
    %253 = arith.divf %251, %252 : vector<8x1xf32>
    %254 = vector.broadcast %246 : vector<8x1xf32> to vector<8x32xf32>
    %255 = arith.subf %242, %254 : vector<8x32xf32>
    %cst_83 = arith.constant 9.99999974E-6 : f32
    %256 = vector.broadcast %cst_83 : f32 to vector<8x1xf32>
    %257 = arith.addf %253, %256 : vector<8x1xf32>
    %258 = math.rsqrt %257 : vector<8x1xf32>
    %259 = vector.broadcast %258 : vector<8x1xf32> to vector<8x32xf32>
    %260 = arith.mulf %255, %259 : vector<8x32xf32>
    %261 = vector.broadcast %10 : vector<1x32xf32> to vector<8x32xf32>
    %262 = arith.mulf %260, %261 : vector<8x32xf32>
    %263 = vector.broadcast %11 : vector<1x32xf32> to vector<8x32xf32>
    %264 = arith.addf %262, %263 : vector<8x32xf32>
    %c0_84 = arith.constant 0 : index
    %c32_85 = arith.constant 32 : index
    %265 = vector.load %arg8[%c0_84, %c32_85] : memref<8x64xf32, #tpu.memory_space<vmem>>, vector<8x32xf32>
    tpu.vector_store %arg8[%c0_84, %c32_85], %264 {strides = array<i32>} : memref<8x64xf32, #tpu.memory_space<vmem>>, vector<8x32xf32>,
    return
  }
}

</mosaic_0001>

<bundles_post_ra>
// kernel: transformer_encoder_layer.1
= control target key start
LH: loop header
LB: loop body
LE: loop exit
PB: predicated region body
PF: predicated region fallthrough
CT: control target
= control target key end

     0   :  { %13 = vsyncpa [#allocation3], 0  ;;  %s2547_s27 = smov [#allocation2]   ;;  %s3036_s0 = inlined_call_operand.vmem [shape: f32[8,64], index: 0, kind: input, shape index: {}]   ;;  %s3037_s1 = inlined_call_operand.vmem [shape: f32[32,96], index: 1, kind: input, shape index: {}]   ;;  %s3038_s2 = inlined_call_operand.vmem [shape: f32[1,96], index: 2, kind: input, shape index: {}]   ;;  %s3039_s3 = inlined_call_operand.vmem [shape: f32[32,32], index: 3, kind: input, shape index: {}]   ;;  %s3040_s4 = inlined_call_operand.vmem [shape: f32[32,64], index: 4, kind: input, shape index: {}]   ;;  %s3041_s5 = inlined_call_operand.vmem [shape: f32[1,64], index: 5, kind: input, shape index: {}]   ;;  %s3042_s6 = inlined_call_operand.vmem [shape: f32[64,32], index: 6, kind: input, shape index: {}]   ;;  %s3043_s7 = inlined_call_operand.hbm [shape: f32[6,32], index: 7, kind: input, shape index: {}]   ;;  %s3044_s8 = inlined_call_operand.vmem [shape: f32[8,64], index: 8, kind: output, shape index: {}]  }
   0x1   :  { %s34_s28 = sshll.u32 %s2547_s27, 4  ;;  %s35_s28 = int_to_ptr.vmem [resolvable:$true] %s34_s28 }
   0x2   :  { %s2533_s29 = scalar_lea.vmem %s35_s28, 128  ;;  %p2538_p1 = scmp.lt.s32.totalorder %s35_s28, %s35_s28 }
   0x3   :  { %p2534_p0 = scmp.ne.s32.totalorder %s35_s28, %s2533_s29  ;;  %p2539_p2 = scmp.lt.s32.totalorder %s2533_s29, %s2533_s29 }
   0x5   :  { %p2540_p3 = por %p2539_p2, %p2538_p1 }
   0x7   :  { %p2541_p4 = pnand %p2540_p3, %p2534_p0 }
   0x9   :  { %2544 = shalt.err (!%p2541_p4)
}
   0xa   :  { %37 = dma.hbm_to_vmem [thread:$0]  %s3043_s7, 128, %s35_s28, [#allocation3]  }
   0xb   :  { %2545 = dma.done.wait [#allocation3], 128  }
   0xc   :  { %2546 = vsyncadd [#allocation3], 4294967168  ;;  %v2548_v0 = vmov 0.0   ;;  %vm2549_vm0 = vmmov 0   ;;  %v2622_v1 = vld [vmem:[%s3037_s1 + $0x18] sm:$0xff]  ;;  %v2627_v2 = vld [vmem:[%s3037_s1 + $0x10] sm:$0xff] }
   0xd   :  { %2283 = vmatprep.subr.mxu1 %v2548_v0  ;;  %2291 = vmatprep.mubr.msk.f32.mxu1 %vm2549_vm0, %v2548_v0  ;;  %v2634_v3 = vld [vmem:[%s3037_s1 + $0x8] sm:$0xff]  ;;  %v2641_v4 = vld [vmem:[%s3037_s1] sm:$0xff]  ;;  %vm76_vm1 = vcmask 261120   ;;  %s2551_s20 = smov 96   ;;  %s2552_s21 = smov 80   ;;  %vm153_vm2 = vcmask 64512  }
   0xe   :  { %2304 = vmatprep.subr.mxu0 %v2548_v0  ;;  %2306 = vmatprep.mubr.msk.f32.mxu0 %vm2549_vm0, %v2548_v0  ;;  %v2647_v5 = vld [vmem:[%s3036_s0] sm:$0xff]  ;;  %s2550_s0 = smov 120   ;;  %s2553_s22 = smov 88   ;;  %vm823_vm3 = vcmask 130048   ;;  %vm825_vm4 = vcmask 195584   ;;  %vm1013_vm5 = vcmask 523264  }
   0xf   :  { %2284 = vmatpush3.msra.mxu1 %v2622_v1  ;;  %v2659_v6 = vld [vmem:[%s3038_s2] ss:$0 sm:$0xff]  ;;  %s2554_s2 = smov 72   ;;  %s2555_s23 = smov 112   ;;  %vm2156_vm6 = vcmask 523520  }
  0x10   :  { %2285 = vmatprep.subr.mxu1 %v2548_v0  ;;  %s2556_s24 = smov 104   ;;  %s2557_s25 = smov 56  }
  0x11   :  { %2286 = vmatpush3.msra.mxu1 %v2627_v2  ;;  %s2558_s26 = smov 64   ;;  %s2559_s27 = smov 48  }
  0x12   :  { %2287 = vmatprep.subr.mxu1 %v2548_v0  ;;  %s2560_s28 = smov 40   ;;  %s2561_s9 = smov 8  }
  0x13   :  { %2288 = vmatpush3.msra.mxu1 %v2634_v3  ;;  %s2562_s15 = smov 16   ;;  %s2563_s16 = smov 24  }
  0x14   :  { %2289 = vmatprep.subr.mxu1 %v2548_v0 }
  0x15   :  { %2290 = vmatpush3.msra.mxu1 %v2641_v4 }
  0x16   :  { %2292 = vmatmul.mubr.msk.f32.vlgmr.msra.gmra.mxu1 %vm76_vm1, %v2647_v5  ;;  %2294 = vmatprep.subr.mxu1 %v2548_v0 }
  0x17   :  { %2296 = vmatprep.mubr.msk.f32.mxu1 %vm2549_vm0, %v2548_v0 }
  0xd6   :  { %v146_v7 = vpop.f32.mrf.mxu1 }
  0xd7   :  { %v2662_v8 = vadd.f32 %v2659_v6, %v146_v7 }
  0xd8   :  { %v2293_v9 = vpop.f32.mrf.mxu1 }
  0xd9   :  { %315 = vrot.lane.b32.xlu1 %v2662_v8, %s2550_s0  ;;  %151 = vrot.lane.b32.xlu0 %v2662_v8, %s2551_s20 }
  0xdd   :  { %482 = vrot.lane.b32.xlu1 %v2662_v8, %s2552_s21  ;;  %317 = vrot.lane.b32.xlu0 %v2662_v8, %s2553_s22 }
  0xe1   :  { %647 = vrot.lane.b32.xlu1 %v2662_v8, %s2554_s2  ;;  %480 = vrot.lane.b32.xlu0 %v2662_v8, %s2555_s23 }
  0xe5   :  { %645 = vrot.lane.b32.xlu0 %v2662_v8, %s2556_s24 }
 0x14b   :  { %v316_v10 = vpop.permute.xlu1 %315  ;;  %v152_v11 = vpop.permute.xlu0 %151 }
 0x14c   :  { %2295 = vmatpush3.xpose.msk.msra.mxu1 %vm153_vm2, %v152_v11 }
 0x14d   :  { %2299 = vmatprep.subr.mxu1 %v2548_v0 }
 0x14f   :  { %2297 = vmatmul.mubr.msk.f32.vlgmr.msra.gmra.mxu1 %vm153_vm2, %v2662_v8  ;;  %v318_v12 = vpop.permute.xlu0 %317  ;;  %v483_v13 = vpop.permute.xlu1 %482 }
 0x150   :  { %2305 = vmatpush3.xpose.msk.msra.mxu0 %vm153_vm2, %v318_v12  ;;  %2301 = vmatprep.mubr.msk.f32.mxu1 %vm2549_vm0, %v2548_v0 }
 0x151   :  { %2314 = vmatprep.subr.mxu0 %v2548_v0 }
 0x153   :  { %2307 = vmatmul.mubr.msk.f32.vlgmr.msra.gmra.mxu0 %vm153_vm2, %v316_v10  ;;  %v481_v14 = vpop.permute.xlu0 %480  ;;  %v648_v15 = vpop.permute.xlu1 %647 }
 0x154   :  { %2315 = vmatpush3.xpose.msk.msra.mxu0 %vm153_vm2, %v483_v13  ;;  %2316 = vmatprep.mubr.msk.f32.mxu0 %vm2549_vm0, %v2548_v0  ;;  %v2742_v13 = vld [vmem:[%s3039_s3 + $0x10] sm:$0xff] }
 0x155   :  { %2324 = vmatprep.subr.mxu0 %v2548_v0 }
 0x157   :  { %2317 = vmatmul.mubr.msk.f32.vlgmr.msra.gmra.mxu0 %vm153_vm2, %v481_v14  ;;  %v646_v16 = vpop.permute.xlu0 %645  ;;  %v2747_v14 = vld [vmem:[%s3039_s3 + $0x8] sm:$0xff] }
 0x158   :  { %2325 = vmatpush3.xpose.msk.msra.mxu0 %vm153_vm2, %v648_v15  ;;  %2326 = vmatprep.mubr.msk.f32.mxu0 %vm2549_vm0, %v2548_v0  ;;  %v2756_v15 = vld [vmem:[%s3039_s3] sm:$0xff] }
 0x159   :  { %2334 = vmatprep.subr.mxu0 %v2548_v0 }
 0x15b   :  { %2327 = vmatmul.mubr.msk.f32.vlgmr.msra.gmra.mxu0 %vm153_vm2, %v646_v16 }
 0x15c   :  { %2342 = vmatprep.mubr.msk.f32.mxu0 %vm2549_vm0, %v2548_v0 }
 0x20f   :  { %v224_v17 = vpop.f32.mrf.mxu1 }
 0x210   :  { %v228_v18 = vsel %vm153_vm2, %v224_v17, -inf }
 0x211   :  { %229 = vmax.xlane.f32.xlu1 %v228_v18  ;;  %v2298_v19 = vpop.f32.mrf.mxu1 }
 0x213   :  { %v389_v20 = vpop.f32.mrf.mxu0 }
 0x214   :  { %v393_v21 = vsel %vm153_vm2, %v389_v20, -inf }
 0x215   :  { %394 = vmax.xlane.f32.xlu0 %v393_v21  ;;  %v2308_v22 = vpop.f32.mrf.mxu0 }
 0x217   :  { %v554_v23 = vpop.f32.mrf.mxu0 }
 0x218   :  { %v558_v24 = vsel %vm153_vm2, %v554_v23, -inf }
 0x219   :  { %559 = vmax.xlane.f32.xlu0 %v558_v24  ;;  %v2318_v25 = vpop.f32.mrf.mxu0 }
 0x21b   :  { %v719_v26 = vpop.f32.mrf.mxu0 }
 0x21c   :  { %v723_v27 = vsel %vm153_vm2, %v719_v26, -inf }
 0x21d   :  { %v2328_v28 = vpop.f32.mrf.mxu0  ;;  %724 = vmax.xlane.f32.xlu1 %v723_v27 }
 0x22e   :  { %404 = vrot.lane.b32.xlu1 %v2662_v8, %s2557_s25 }
 0x29a   :  { %v230_v29 = vpop.xlane.xlu1 %229 }
 0x29b   :  { %v231_v30 = vsub.f32 %v224_v17, %v230_v29 }
 0x29d   :  { %v232_v31 = vmul.f32 1.442695, %v231_v30 }
 0x29e   :  { %v395_v32 = vpop.xlane.xlu0 %394 }
 0x29f   :  { %2485 = vpow2.f32 %v232_v31  ;;  %v396_v33 = vsub.f32 %v389_v20, %v395_v32 }
 0x2a1   :  { %v397_v34 = vmul.f32 1.442695, %v396_v33 }
 0x2a2   :  { %v560_v44 = vpop.xlane.xlu0 %559 }
 0x2a3   :  { %2487 = vpow2.f32 %v397_v34  ;;  %v561_v45 = vsub.f32 %v554_v23, %v560_v44  ;;  %v2826_v44 = vld [vmem:[%s3042_s6 + $0x20] sm:$0xff] }
 0x2a5   :  { %v562_v46 = vmul.f32 1.442695, %v561_v45  ;;  %v2833_v45 = vld [vmem:[%s3042_s6 + $0x18] sm:$0xff] }
 0x2a6   :  { %v725_v35 = vpop.xlane.xlu1 %724 }
 0x2a7   :  { %v726_v36 = vsub.f32 %v719_v26, %v725_v35  ;;  %v2768_v26 = vld [vmem:[#allocation2] ss:$0 sm:$0xff] }
 0x2a9   :  { %v727_v37 = vmul.f32 1.442695, %v726_v36 }
 0x2aa   :  { %v405_v49 = vpop.permute.xlu1 %404 }
 0x2ab   :  { %2489 = vpow2.f32 %v727_v37  ;;  %v2779_v37 = vld [vmem:[%s3040_s4 + $0x18] sm:$0xff] }
 0x2ac   :  { %v2486_v38 = vpop.eup %2485  ;;  %2491 = vpow2.f32 %v562_v46 }
 0x2ad   :  { %v234_v39 = vsel %vm153_vm2, %v2486_v38, 0.0 }
 0x2ae   :  { %235 = vadd.xlane.f32.xlu0 %v234_v39  ;;  %v2791_v39 = vld [vmem:[%s3040_s4 + $0x8] sm:$0xff] }
 0x2b0   :  { %v2488_v40 = vpop.eup %2487 }
 0x2b1   :  { %v399_v41 = vsel %vm153_vm2, %v2488_v40, 0.0 }
 0x2b2   :  { %400 = vadd.xlane.f32.xlu1 %v399_v41  ;;  %v2807_v41 = vld [vmem:[%s3042_s6 + $0x38] sm:$0xff] }
 0x2b8   :  { %v2490_v42 = vpop.eup %2489 }
 0x2b9   :  { %v729_v43 = vsel %vm153_vm2, %v2490_v42, 0.0  ;;  %v2492_v47 = vpop.eup %2491 }
 0x2ba   :  { %730 = vadd.xlane.f32.xlu1 %v729_v43  ;;  %v564_v48 = vsel %vm153_vm2, %v2492_v47, 0.0  ;;  %v2819_v43 = vld [vmem:[%s3042_s6 + $0x28] sm:$0xff] }
 0x2c4   :  { %239 = vrot.lane.b32.xlu0 %v2662_v8, %s2558_s26 }
 0x2cb   :  { %569 = vrot.lane.b32.xlu1 %v2662_v8, %s2559_s27 }
 0x2e3   :  { %565 = vadd.xlane.f32.xlu0 %v564_v48 }
 0x2f9   :  { %734 = vrot.lane.b32.xlu0 %v2662_v8, %s2560_s28  ;;  %v2734_v8 = vld [vmem:[%s3039_s3 + $0x18] sm:$0xff] }
 0x2fa   :  { %2335 = vmatpush3.msra.mxu0 %v2734_v8 }
 0x2fb   :  { %2336 = vmatprep.subr.mxu0 %v2548_v0 }
 0x2fc   :  { %2337 = vmatpush3.msra.mxu0 %v2742_v13 }
 0x2fd   :  { %2338 = vmatprep.subr.mxu0 %v2548_v0 }
 0x2fe   :  { %2339 = vmatpush3.msra.mxu0 %v2747_v14 }
 0x2ff   :  { %2340 = vmatprep.subr.mxu0 %v2548_v0 }
 0x300   :  { %2341 = vmatpush3.msra.mxu0 %v2756_v15 }
 0x301   :  { %2356 = vmatprep.subr.mxu0 %v2548_v0 }
 0x337   :  { %v236_v50 = vpop.xlane.xlu0 %235 }
 0x338   :  { %2493 = vrcp.f32 %v236_v50  ;;  %v2839_v50 = vld [vmem:[#allocation2 + $0x1] ss:$0 sm:$0xff] }
 0x33b   :  { %v240_v51 = vpop.permute.xlu0 %239  ;;  %v401_v52 = vpop.xlane.xlu1 %400 }
 0x33c   :  { %2495 = vrcp.f32 %v401_v52  ;;  %2300 = vmatpush3.msra.mxu1 %v240_v51  ;;  %v2841_v52 = vld [vmem:[#allocation2 + $0x2] ss:$0 sm:$0xff] }
 0x33d   :  { %2309 = vmatprep.subr.mxu1 %v2548_v0 }
 0x343   :  { %v731_v54 = vpop.xlane.xlu1 %730 }
 0x345   :  { %v2494_v53 = vpop.eup %2493 }
 0x346   :  { %v238_v55 = vmul.f32 %v2494_v53, %v2486_v38  ;;  %v2786_v38 = vld [vmem:[%s3040_s4 + $0x10] sm:$0xff] }
 0x347   :  { %v570_v58 = vpop.permute.xlu1 %569 }
 0x348   :  { %2302 = vmatmul.mubr.msk.f32.vlgmr.msra.gmra.mxu1 %vm153_vm2, %v238_v55 }
 0x349   :  { %v2496_v56 = vpop.eup %2495  ;;  %2310 = vmatpush3.msra.mxu1 %v405_v49  ;;  %2311 = vmatprep.mubr.msk.f32.mxu1 %vm2549_vm0, %v2548_v0 }
 0x34a   :  { %2319 = vmatprep.subr.mxu1 %v2548_v0  ;;  %v403_v57 = vmul.f32 %v2496_v56, %v2488_v40  ;;  %v2798_v40 = vld [vmem:[%s3040_s4] sm:$0xff] }
 0x34c   :  { %2312 = vmatmul.mubr.msk.f32.vlgmr.msra.gmra.mxu1 %vm153_vm2, %v403_v57 }
 0x34d   :  { %2320 = vmatpush3.msra.mxu1 %v570_v58  ;;  %2321 = vmatprep.mubr.msk.f32.mxu1 %vm2549_vm0, %v2548_v0 }
 0x34e   :  { %2329 = vmatprep.subr.mxu1 %v2548_v0 }
 0x36c   :  { %v566_v59 = vpop.xlane.xlu0 %565 }
 0x36d   :  { %2497 = vrcp.f32 %v566_v59 }
 0x36e   :  { %2499 = vrcp.f32 %v731_v54 }
 0x370   :  { %v735_v63 = vpop.permute.xlu0 %734 }
 0x37a   :  { %v2498_v60 = vpop.eup %2497 }
 0x37b   :  { %v568_v61 = vmul.f32 %v2498_v60, %v2492_v47  ;;  %v2500_v62 = vpop.eup %2499 }
 0x37c   :  { %v733_v7 = vmul.f32 %v2500_v62, %v2490_v42  ;;  %v2812_v42 = vld [vmem:[%s3042_s6 + $0x30] sm:$0xff] }
 0x37d   :  { %2322 = vmatmul.mubr.msk.f32.vlgmr.msra.gmra.mxu1 %vm153_vm2, %v568_v61 }
 0x37e   :  { %2330 = vmatpush3.msra.mxu1 %v735_v63  ;;  %2331 = vmatprep.mubr.msk.f32.mxu1 %vm2549_vm0, %v2548_v0 }
 0x37f   :  { %2345 = vmatprep.subr.mxu1 %v2548_v0 }
 0x381   :  { %2332 = vmatmul.mubr.msk.f32.vlgmr.msra.gmra.mxu1 %vm153_vm2, %v733_v7 }
 0x382   :  { %2353 = vmatprep.mubr.msk.f32.mxu1 %vm2549_vm0, %v2548_v0  ;;  %2346 = vmatpush3.msra.mxu1 %v2779_v37 }
 0x383   :  { %2347 = vmatprep.subr.mxu1 %v2548_v0 }
 0x384   :  { %2348 = vmatpush3.msra.mxu1 %v2786_v38 }
 0x385   :  { %2349 = vmatprep.subr.mxu1 %v2548_v0 }
 0x386   :  { %2350 = vmatpush3.msra.mxu1 %v2791_v39 }
 0x387   :  { %2351 = vmatprep.subr.mxu1 %v2548_v0 }
 0x388   :  { %2352 = vmatpush3.msra.mxu1 %v2798_v40 }
 0x389   :  { %2375 = vmatprep.subr.mxu1 %v2548_v0 }
 0x408   :  { %v311_v9 = vpop.f32.mrf.mxu1 }
 0x40a   :  { %v2303_v10 = vpop.f32.mrf.mxu1 }
 0x40c   :  { %v476_v11 = vpop.f32.mrf.mxu1 }
 0x40d   :  { %811 = vrot.lane.b32.xlu1 %v476_v11, %s2561_s9 }
 0x40e   :  { %v2313_v12 = vpop.f32.mrf.mxu1 }
 0x43d   :  { %v641_v16 = vpop.f32.mrf.mxu1 }
 0x43e   :  { %815 = vrot.lane.b32.xlu0 %v641_v16, %s2562_s15 }
 0x43f   :  { %v2323_v17 = vpop.f32.mrf.mxu1 }
 0x441   :  { %v806_v18 = vpop.f32.mrf.mxu1 }
 0x442   :  { %819 = vrot.lane.b32.xlu1 %v806_v18, %s2563_s16 }
 0x443   :  { %v2333_v19 = vpop.f32.mrf.mxu1 }
 0x47f   :  { %v812_v20 = vpop.permute.xlu1 %811 }
 0x480   :  { %v822_v22 = vsel %vm153_vm2, %v311_v9, %v812_v20 }
 0x4b0   :  { %v816_v21 = vpop.permute.xlu0 %815 }
 0x4b1   :  { %v824_v23 = vsel %vm823_vm3, %v822_v22, %v816_v21 }
 0x4b4   :  { %v820_v24 = vpop.permute.xlu1 %819 }
 0x4b5   :  { %v826_v25 = vsel %vm825_vm4, %v824_v23, %v820_v24 }
 0x4b6   :  { %2343 = vmatmul.mubr.msk.f32.vlgmr.msra.gmra.mxu0 %vm76_vm1, %v826_v25 }
 0x4b7   :  { %2372 = vmatprep.mubr.msk.f32.mxu0 %vm2549_vm0, %v2548_v0  ;;  %2357 = vmatpush3.msra.mxu0 %v2807_v41 }
 0x4b8   :  { %2358 = vmatprep.subr.mxu0 %v2548_v0 }
 0x4b9   :  { %2359 = vmatpush3.msra.mxu0 %v2812_v42 }
 0x4ba   :  { %2360 = vmatprep.subr.mxu0 %v2548_v0 }
 0x4bb   :  { %2361 = vmatpush3.msra.mxu0 %v2819_v43 }
 0x4bc   :  { %2362 = vmatprep.subr.mxu0 %v2548_v0 }
 0x4bd   :  { %2363 = vmatpush3.msra.mxu0 %v2826_v44 }
 0x4be   :  { %2364 = vmatprep.subr.mxu0 %v2548_v0 }
 0x4bf   :  { %2365 = vmatpush3.msra.mxu0 %v2833_v45 }
 0x4c0   :  { %2366 = vmatprep.subr.mxu0 %v2548_v0 }
 0x576   :  { %v900_v27 = vpop.f32.mrf.mxu0 }
 0x577   :  { %v901_v28 = vadd.f32 %v2768_v26, %v900_v27 }
 0x578   :  { %v2344_v29 = vpop.f32.mrf.mxu0 }
 0x579   :  { %v904_v30 = vadd.f32 %v901_v28, %v2647_v5 }
 0x57b   :  { %v905_v31 = vsel %vm76_vm1, %v904_v30, 0.0 }
 0x57c   :  { %906 = vadd.xlane.f32.xlu0 %v905_v31 }
 0x592   :  { %1114 = vrot.lane.b32.xlu0 %v2647_v5, %s2551_s20 }
 0x605   :  { %v907_v32 = vpop.xlane.xlu0 %906 }
 0x606   :  { %v909_v33 = vmul.f32 0.03125, %v907_v32 }
 0x608   :  { %v910_v34 = vsub.f32 %v904_v30, %v909_v33 }
 0x609   :  { %v1115_v55 = vpop.permute.xlu0 %1114 }
 0x60a   :  { %v911_v35 = vmul.f32 %v910_v34, %v910_v34 }
 0x60c   :  { %v912_v36 = vsel %vm76_vm1, %v911_v35, 0.0 }
 0x60d   :  { %913 = vadd.xlane.f32.xlu1 %v912_v36 }
 0x696   :  { %v914_v46 = vpop.xlane.xlu1 %913 }
 0x697   :  { %v915_v47 = vmul.f32 0.03125, %v914_v46 }
 0x699   :  { %v916_v48 = vadd.f32 1e-05, %v915_v47 }
 0x69b   :  { %2501 = vrsqrt.f32 %v916_v48 }
 0x6a8   :  { %v2502_v49 = vpop.eup %2501 }
 0x6a9   :  { %v918_v51 = vmul.f32 %v2502_v49, %v910_v34 }
 0x6ab   :  { %v923_v53 = vmul.f32 %v2839_v50, %v918_v51 }
 0x6ad   :  { %v2845_v54 = vadd.f32 %v2841_v52, %v923_v53 }
 0x6af   :  { %2354 = vmatmul.mubr.msk.f32.vlgmr.msra.gmra.mxu1 %vm76_vm1, %v2845_v54 }
 0x6b0   :  { %2376 = vmatpush3.msra.mxu1 %v2622_v1  ;;  %2383 = vmatprep.mubr.msk.f32.mxu1 %vm2549_vm0, %v2548_v0  ;;  %v2865_v1 = vld [vmem:[%s3042_s6 + $0x10] sm:$0xff] }
 0x6b1   :  { %2377 = vmatprep.subr.mxu1 %v2548_v0  ;;  %2367 = vmatpush3.msra.mxu0 %v2865_v1 }
 0x6b2   :  { %2378 = vmatpush3.msra.mxu1 %v2627_v2  ;;  %2368 = vmatprep.subr.mxu0 %v2548_v0  ;;  %v2872_v2 = vld [vmem:[%s3042_s6 + $0x8] sm:$0xff] }
 0x6b3   :  { %2379 = vmatprep.subr.mxu1 %v2548_v0  ;;  %2369 = vmatpush3.msra.mxu0 %v2872_v2 }
 0x6b4   :  { %2380 = vmatpush3.msra.mxu1 %v2634_v3  ;;  %v2878_v3 = vld [vmem:[%s3042_s6] sm:$0xff]  ;;  %2370 = vmatprep.subr.mxu0 %v2548_v0 }
 0x6b5   :  { %2381 = vmatprep.subr.mxu1 %v2548_v0  ;;  %2371 = vmatpush3.msra.mxu0 %v2878_v3 }
 0x6b6   :  { %2382 = vmatpush3.msra.mxu1 %v2641_v4  ;;  %2396 = vmatprep.subr.mxu0 %v2548_v0  ;;  %v2886_v4 = vld [vmem:[%s3041_s5] ss:$0 sm:$0xff]  ;;  %s2564_s5 = smov 32  }
 0x6b7   :  { %2384 = vmatmul.mubr.msk.f32.vlgmr.msra.gmra.mxu1 %vm76_vm1, %v1115_v55  ;;  %2386 = vmatprep.subr.mxu1 %v2548_v0 }
 0x6b8   :  { %2388 = vmatprep.mubr.msk.f32.mxu1 %vm2549_vm0, %v2548_v0 }
 0x76f   :  { %v1004_v56 = vpop.f32.mrf.mxu1 }
 0x770   :  { %v1005_v57 = vadd.f32 %v2886_v4, %v1004_v56 }
 0x771   :  { %v2355_v58 = vpop.f32.mrf.mxu1 }
 0x772   :  { %v1008_v59 = vmax.f32 %v1005_v57, 0.0 }
 0x774   :  { %2373 = vmatmul.mubr.msk.f32.vlgmr.msra.gmra.mxu0 %vm1013_vm5, %v1008_v59 }
 0x775   :  { %2398 = vmatprep.mubr.msk.f32.mxu0 %vm2549_vm0, %v2548_v0 }
 0x777   :  { %v1184_v60 = vpop.f32.mrf.mxu1 }
 0x778   :  { %v2893_v61 = vadd.f32 %v2659_v6, %v1184_v60 }
 0x779   :  { %v2385_v62 = vpop.f32.mrf.mxu1 }
 0x77a   :  { %1354 = vrot.lane.b32.xlu0 %v2893_v61, %s2553_s22  ;;  %1189 = vrot.lane.b32.xlu1 %v2893_v61, %s2551_s20 }
 0x77e   :  { %1519 = vrot.lane.b32.xlu0 %v2893_v61, %s2552_s21  ;;  %1352 = vrot.lane.b32.xlu1 %v2893_v61, %s2550_s0 }
 0x782   :  { %1684 = vrot.lane.b32.xlu0 %v2893_v61, %s2554_s2  ;;  %1517 = vrot.lane.b32.xlu1 %v2893_v61, %s2555_s23 }
 0x786   :  { %1682 = vrot.lane.b32.xlu1 %v2893_v61, %s2556_s24 }
 0x7ec   :  { %v1355_v6 = vpop.permute.xlu0 %1354  ;;  %v1190_v63 = vpop.permute.xlu1 %1189 }
 0x7ed   :  { %2387 = vmatpush3.xpose.msk.msra.mxu1 %vm153_vm2, %v1190_v63  ;;  %2397 = vmatpush3.xpose.msk.msra.mxu0 %vm153_vm2, %v1355_v6 }
 0x7ee   :  { %2406 = vmatprep.subr.mxu0 %v2548_v0  ;;  %2391 = vmatprep.subr.mxu1 %v2548_v0 }
 0x7f0   :  { %v1520_v7 = vpop.permute.xlu0 %1519  ;;  %2389 = vmatmul.mubr.msk.f32.vlgmr.msra.gmra.mxu1 %vm153_vm2, %v2893_v61  ;;  %v1353_v9 = vpop.permute.xlu1 %1352 }
 0x7f1   :  { %2399 = vmatmul.mubr.msk.f32.vlgmr.msra.gmra.mxu0 %vm153_vm2, %v1353_v9  ;;  %2393 = vmatprep.mubr.msk.f32.mxu1 %vm2549_vm0, %v2548_v0 }
 0x7f2   :  { %2407 = vmatpush3.xpose.msk.msra.mxu0 %vm153_vm2, %v1520_v7  ;;  %2408 = vmatprep.mubr.msk.f32.mxu0 %vm2549_vm0, %v2548_v0 }
 0x7f3   :  { %2416 = vmatprep.subr.mxu0 %v2548_v0 }
 0x7f4   :  { %v1685_v10 = vpop.permute.xlu0 %1684  ;;  %v1518_v11 = vpop.permute.xlu1 %1517 }
 0x7f5   :  { %2409 = vmatmul.mubr.msk.f32.vlgmr.msra.gmra.mxu0 %vm153_vm2, %v1518_v11 }
 0x7f6   :  { %2417 = vmatpush3.xpose.msk.msra.mxu0 %vm153_vm2, %v1685_v10  ;;  %2418 = vmatprep.mubr.msk.f32.mxu0 %vm2549_vm0, %v2548_v0 }
 0x7f7   :  { %2426 = vmatprep.subr.mxu0 %v2548_v0 }
 0x7f8   :  { %v1683_v12 = vpop.permute.xlu1 %1682 }
 0x7f9   :  { %2419 = vmatmul.mubr.msk.f32.vlgmr.msra.gmra.mxu0 %vm153_vm2, %v1683_v12 }
 0x7fa   :  { %2427 = vmatpush3.msra.mxu0 %v2734_v8  ;;  %2434 = vmatprep.mubr.msk.f32.mxu0 %vm2549_vm0, %v2548_v0 }
 0x7fb   :  { %2428 = vmatprep.subr.mxu0 %v2548_v0 }
 0x7fc   :  { %2429 = vmatpush3.msra.mxu0 %v2742_v13 }
 0x7fd   :  { %2430 = vmatprep.subr.mxu0 %v2548_v0 }
 0x7fe   :  { %2431 = vmatpush3.msra.mxu0 %v2747_v14 }
 0x7ff   :  { %2432 = vmatprep.subr.mxu0 %v2548_v0 }
 0x800   :  { %2433 = vmatpush3.msra.mxu0 %v2756_v15 }
 0x801   :  { %2448 = vmatprep.subr.mxu0 %v2548_v0 }
 0x834   :  { %v2938_v16 = vpop.f32.mrf.mxu0 }
 0x836   :  { %v2374_v8 = vpop.f32.mrf.mxu0 }
 0x8b0   :  { %v1261_v17 = vpop.f32.mrf.mxu1 }
 0x8b1   :  { %v1426_v18 = vpop.f32.mrf.mxu0  ;;  %v1265_v19 = vsel %vm153_vm2, %v1261_v17, -inf }
 0x8b2   :  { %1266 = vmax.xlane.f32.xlu0 %v1265_v19  ;;  %v2390_v20 = vpop.f32.mrf.mxu1  ;;  %v1430_v13 = vsel %vm153_vm2, %v1426_v18, -inf }
 0x8b3   :  { %1431 = vmax.xlane.f32.xlu1 %v1430_v13  ;;  %v2400_v21 = vpop.f32.mrf.mxu0 }
 0x8b5   :  { %v1591_v14 = vpop.f32.mrf.mxu0 }
 0x8b6   :  { %v1595_v22 = vsel %vm153_vm2, %v1591_v14, -inf }
 0x8b7   :  { %v2410_v23 = vpop.f32.mrf.mxu0  ;;  %1596 = vmax.xlane.f32.xlu0 %v1595_v22 }
 0x8b9   :  { %v1756_v15 = vpop.f32.mrf.mxu0 }
 0x8ba   :  { %v1760_v24 = vsel %vm153_vm2, %v1756_v15, -inf }
 0x8bb   :  { %v2420_v25 = vpop.f32.mrf.mxu0  ;;  %1761 = vmax.xlane.f32.xlu0 %v1760_v24 }
 0x8c4   :  { %1276 = vrot.lane.b32.xlu1 %v2893_v61, %s2558_s26 }
 0x93b   :  { %v1267_v27 = vpop.xlane.xlu0 %1266 }
 0x93c   :  { %v1268_v28 = vsub.f32 %v1261_v17, %v1267_v27  ;;  %v1432_v29 = vpop.xlane.xlu1 %1431 }
 0x93d   :  { %v1433_v30 = vsub.f32 %v1426_v18, %v1432_v29 }
 0x93e   :  { %v1269_v31 = vmul.f32 1.442695, %v1268_v28 }
 0x93f   :  { %v1434_v32 = vmul.f32 1.442695, %v1433_v30 }
 0x940   :  { %2503 = vpow2.f32 %v1269_v31  ;;  %v1277_v33 = vpop.permute.xlu1 %1276  ;;  %v1597_v34 = vpop.xlane.xlu0 %1596 }
 0x941   :  { %2505 = vpow2.f32 %v1434_v32  ;;  %v1598_v35 = vsub.f32 %v1591_v14, %v1597_v34  ;;  %2392 = vmatpush3.msra.mxu1 %v1277_v33 }
 0x942   :  { %2401 = vmatprep.subr.mxu1 %v2548_v0 }
 0x943   :  { %v1599_v36 = vmul.f32 1.442695, %v1598_v35 }
 0x944   :  { %v1762_v46 = vpop.xlane.xlu0 %1761 }
 0x945   :  { %2507 = vpow2.f32 %v1599_v36  ;;  %v1763_v47 = vsub.f32 %v1756_v15, %v1762_v46 }
 0x947   :  { %v1764_v48 = vmul.f32 1.442695, %v1763_v47 }
 0x949   :  { %2509 = vpow2.f32 %v1764_v48 }
 0x94d   :  { %v2504_v49 = vpop.eup %2503 }
 0x94e   :  { %v2506_v51 = vpop.eup %2505  ;;  %v1271_v53 = vsel %vm153_vm2, %v2504_v49, 0.0 }
 0x94f   :  { %1272 = vadd.xlane.f32.xlu1 %v1271_v53  ;;  %v1436_v55 = vsel %vm153_vm2, %v2506_v51, 0.0 }
 0x950   :  { %1437 = vadd.xlane.f32.xlu0 %v1436_v55  ;;  %v2183_v55 = vld [vmem:[#allocation2 + $0x3] ss:$0 sm:$0xff] }
 0x952   :  { %v2508_v56 = vpop.eup %2507 }
 0x953   :  { %v1601_v57 = vsel %vm153_vm2, %v2508_v56, 0.0 }
 0x954   :  { %1602 = vadd.xlane.f32.xlu1 %v1601_v57 }
 0x956   :  { %v2510_v58 = vpop.eup %2509 }
 0x957   :  { %v1766_v59 = vsel %vm153_vm2, %v2510_v58, 0.0 }
 0x958   :  { %1767 = vadd.xlane.f32.xlu0 %v1766_v59 }
 0x965   :  { %1606 = vrot.lane.b32.xlu1 %v2893_v61, %s2559_s27 }
 0x969   :  { %1771 = vrot.lane.b32.xlu1 %v2893_v61, %s2560_s28 }
 0x96e   :  { %1441 = vrot.lane.b32.xlu0 %v2893_v61, %s2557_s25 }
 0x9d8   :  { %v1273_v60 = vpop.xlane.xlu1 %1272 }
 0x9d9   :  { %2511 = vrcp.f32 %v1273_v60  ;;  %v1438_v62 = vpop.xlane.xlu0 %1437 }
 0x9da   :  { %2513 = vrcp.f32 %v1438_v62  ;;  %v1084_v62 = vadd.f32 %v2183_v55, %v2938_v16 }
 0x9dd   :  { %v1603_v6 = vpop.xlane.xlu1 %1602 }
 0x9de   :  { %2515 = vrcp.f32 %v1603_v6  ;;  %v1087_v6 = vadd.f32 %v1084_v62, %v2845_v54  ;;  %v2186_v54 = vld [vmem:[#allocation2 + $0x5] ss:$0 sm:$0xff] }
 0x9e1   :  { %v1768_v63 = vpop.xlane.xlu0 %1767  ;;  %v1607_v12 = vpop.permute.xlu1 %1606 }
 0x9e2   :  { %2517 = vrcp.f32 %v1768_v63 }
 0x9e5   :  { %v1442_v11 = vpop.permute.xlu0 %1441  ;;  %v1772_v19 = vpop.permute.xlu1 %1771 }
 0x9e6   :  { %v2512_v7 = vpop.eup %2511 }
 0x9e7   :  { %v1275_v9 = vmul.f32 %v2512_v7, %v2504_v49  ;;  %v2514_v10 = vpop.eup %2513 }
 0x9e8   :  { %v1440_v61 = vmul.f32 %v2514_v10, %v2506_v51 }
 0x9e9   :  { %2394 = vmatmul.mubr.msk.f32.vlgmr.msra.gmra.mxu1 %vm153_vm2, %v1275_v9 }
 0x9ea   :  { %2402 = vmatpush3.msra.mxu1 %v1442_v11  ;;  %2403 = vmatprep.mubr.msk.f32.mxu1 %vm2549_vm0, %v2548_v0 }
 0x9eb   :  { %2411 = vmatprep.subr.mxu1 %v2548_v0  ;;  %v2516_v8 = vpop.eup %2515 }
 0x9ec   :  { %v1605_v17 = vmul.f32 %v2516_v8, %v2508_v56 }
 0x9ed   :  { %2404 = vmatmul.mubr.msk.f32.vlgmr.msra.gmra.mxu1 %vm153_vm2, %v1440_v61 }
 0x9ee   :  { %2412 = vmatpush3.msra.mxu1 %v1607_v12  ;;  %2413 = vmatprep.mubr.msk.f32.mxu1 %vm2549_vm0, %v2548_v0 }
 0x9ef   :  { %2421 = vmatprep.subr.mxu1 %v2548_v0  ;;  %v2518_v18 = vpop.eup %2517 }
 0x9f0   :  { %v1770_v20 = vmul.f32 %v2518_v18, %v2510_v58 }
 0x9f1   :  { %2414 = vmatmul.mubr.msk.f32.vlgmr.msra.gmra.mxu1 %vm153_vm2, %v1605_v17 }
 0x9f2   :  { %2422 = vmatpush3.msra.mxu1 %v1772_v19  ;;  %2423 = vmatprep.mubr.msk.f32.mxu1 %vm2549_vm0, %v2548_v0 }
 0x9f3   :  { %2437 = vmatprep.subr.mxu1 %v2548_v0 }
 0x9f5   :  { %2424 = vmatmul.mubr.msk.f32.vlgmr.msra.gmra.mxu1 %vm153_vm2, %v1770_v20 }
 0x9f6   :  { %2438 = vmatpush3.msra.mxu1 %v2779_v37  ;;  %2445 = vmatprep.mubr.msk.f32.mxu1 %vm2549_vm0, %v2548_v0 }
 0x9f7   :  { %2439 = vmatprep.subr.mxu1 %v2548_v0 }
 0x9f8   :  { %2440 = vmatpush3.msra.mxu1 %v2786_v38 }
 0x9f9   :  { %2441 = vmatprep.subr.mxu1 %v2548_v0 }
 0x9fa   :  { %2442 = vmatpush3.msra.mxu1 %v2791_v39 }
 0x9fb   :  { %2443 = vmatprep.subr.mxu1 %v2548_v0 }
 0x9fc   :  { %2444 = vmatpush3.msra.mxu1 %v2798_v40 }
 0xaa9   :  { %v1348_v13 = vpop.f32.mrf.mxu1 }
 0xaab   :  { %v2395_v21 = vpop.f32.mrf.mxu1 }
 0xaad   :  { %v1513_v14 = vpop.f32.mrf.mxu1 }
 0xaae   :  { %1848 = vrot.lane.b32.xlu0 %v1513_v14, %s2561_s9  ;;  %v2185_v14 = vld [vmem:[#allocation2 + $0x4] ss:$0 sm:$0xff] }
 0xaaf   :  { %v2405_v37 = vpop.f32.mrf.mxu1 }
 0xab1   :  { %v1678_v22 = vpop.f32.mrf.mxu1 }
 0xab2   :  { %1852 = vrot.lane.b32.xlu1 %v1678_v22, %s2562_s15 }
 0xab3   :  { %v2415_v23 = vpop.f32.mrf.mxu1 }
 0xab5   :  { %v1843_v15 = vpop.f32.mrf.mxu1 }
 0xab6   :  { %1856 = vrot.lane.b32.xlu0 %v1843_v15, %s2563_s16 }
 0xab7   :  { %v2425_v38 = vpop.f32.mrf.mxu1 }
 0xb20   :  { %v1849_v24 = vpop.permute.xlu0 %1848 }
 0xb21   :  { %v1859_v25 = vsel %vm153_vm2, %v1348_v13, %v1849_v24 }
 0xb24   :  { %v1853_v39 = vpop.permute.xlu1 %1852 }
 0xb25   :  { %v1860_v40 = vsel %vm823_vm3, %v1859_v25, %v1853_v39 }
 0xb28   :  { %v1857_v27 = vpop.permute.xlu0 %1856 }
 0xb29   :  { %v1861_v28 = vsel %vm825_vm4, %v1860_v40, %v1857_v27 }
 0xb2a   :  { %2435 = vmatmul.mubr.msk.f32.vlgmr.msra.gmra.mxu0 %vm76_vm1, %v1861_v28 }
 0xb2b   :  { %2449 = vmatpush3.msra.mxu0 %v2807_v41  ;;  %2464 = vmatprep.mubr.msk.f32.mxu0 %vm2549_vm0, %v2548_v0 }
 0xb2c   :  { %2450 = vmatprep.subr.mxu0 %v2548_v0 }
 0xb2d   :  { %2451 = vmatpush3.msra.mxu0 %v2812_v42 }
 0xb2e   :  { %2452 = vmatprep.subr.mxu0 %v2548_v0 }
 0xb2f   :  { %2453 = vmatpush3.msra.mxu0 %v2819_v43 }
 0xb30   :  { %2454 = vmatprep.subr.mxu0 %v2548_v0 }
 0xb31   :  { %2455 = vmatpush3.msra.mxu0 %v2826_v44 }
 0xb32   :  { %2456 = vmatprep.subr.mxu0 %v2548_v0 }
 0xb33   :  { %2457 = vmatpush3.msra.mxu0 %v2833_v45 }
 0xb34   :  { %2458 = vmatprep.subr.mxu0 %v2548_v0 }
 0xb35   :  { %2459 = vmatpush3.msra.mxu0 %v2865_v1 }
 0xb36   :  { %2460 = vmatprep.subr.mxu0 %v2548_v0 }
 0xb37   :  { %2461 = vmatpush3.msra.mxu0 %v2872_v2 }
 0xb38   :  { %2462 = vmatprep.subr.mxu0 %v2548_v0 }
 0xb39   :  { %2463 = vmatpush3.msra.mxu0 %v2878_v3 }
 0xbea   :  { %v1931_v41 = vpop.f32.mrf.mxu0 }
 0xbeb   :  { %v1932_v42 = vadd.f32 %v2768_v26, %v1931_v41 }
 0xbec   :  { %v2436_v43 = vpop.f32.mrf.mxu0 }
 0xbed   :  { %1936 = vrot.lane.b32.xlu1 %v1932_v42, %s2564_s5 }
 0xc5f   :  { %v1937_v44 = vpop.permute.xlu1 %1936 }
 0xc60   :  { %v1939_v45 = vadd.f32 %v1937_v44, %v2647_v5 }
 0xc62   :  { %1941 = vrot.lane.b32.xlu0 %v1939_v45, %s2551_s20 }
 0xcd4   :  { %v1942_v1 = vpop.permute.xlu0 %1941 }
 0xcd5   :  { %v1944_v29 = vsel %vm76_vm1, %v1942_v1, 0.0 }
 0xcd6   :  { %1945 = vadd.xlane.f32.xlu1 %v1944_v29 }
 0xce7   :  { %1962 = vrot.lane.b32.xlu1 %v2839_v50, %s2564_s5 }
 0xd5f   :  { %v1946_v0 = vpop.xlane.xlu1 %1945 }
 0xd60   :  { %v1947_v2 = vmul.f32 0.03125, %v1946_v0 }
 0xd62   :  { %v1948_v3 = vsub.f32 %v1939_v45, %v1947_v2 }
 0xd63   :  { %v1963_v35 = vpop.permute.xlu1 %1962 }
 0xd64   :  { %v1949_v26 = vmul.f32 %v1948_v3, %v1948_v3 }
 0xd66   :  { %1951 = vrot.lane.b32.xlu0 %v1949_v26, %s2551_s20 }
 0xdd8   :  { %v1952_v30 = vpop.permute.xlu0 %1951 }
 0xdd9   :  { %v1954_v31 = vsel %vm76_vm1, %v1952_v30, 0.0 }
 0xdda   :  { %1955 = vadd.xlane.f32.xlu0 %v1954_v31 }
 0xdf0   :  { %1967 = vrot.lane.b32.xlu0 %v2841_v52, %s2564_s5 }
 0xe63   :  { %v1956_v5 = vpop.xlane.xlu0 %1955 }
 0xe64   :  { %v1957_v32 = vmul.f32 0.03125, %v1956_v5 }
 0xe66   :  { %v1958_v33 = vadd.f32 1e-05, %v1957_v32 }
 0xe67   :  { %v1968_v36 = vpop.permute.xlu0 %1967 }
 0xe68   :  { %2519 = vrsqrt.f32 %v1958_v33 }
 0xe75   :  { %v2520_v34 = vpop.eup %2519 }
 0xe76   :  { %v1960_v50 = vmul.f32 %v2520_v34, %v1948_v3 }
 0xe78   :  { %v1965_v46 = vmul.f32 %v1963_v35, %v1960_v50 }
 0xe7a   :  { %v1970_v47 = vadd.f32 %v1968_v36, %v1965_v46 }
 0xe7c   :  { %1972 = vrot.lane.b32.xlu1 %v1970_v47, %s2551_s20 }
 0xeee   :  { %v1973_v48 = vpop.permute.xlu1 %1972 }
 0xeef   :  { %2446 = vmatmul.mubr.msk.f32.vlgmr.msra.gmra.mxu1 %vm76_vm1, %v1973_v48 }
 0xfaf   :  { %v2042_v49 = vpop.f32.mrf.mxu1 }
 0xfb0   :  { %v2043_v51 = vadd.f32 %v2886_v4, %v2042_v49  ;;  %v1088_v4 = vsel %vm76_vm1, %v1087_v6, 0.0 }
 0xfb1   :  { %v2447_v53 = vpop.f32.mrf.mxu1 }
 0xfb2   :  { %v2046_v52 = vmax.f32 %v2043_v51, 0.0 }
 0xfb4   :  { %2465 = vmatmul.mubr.msk.f32.vlgmr.msra.gmra.mxu0 %vm1013_vm5, %v2046_v52 }
0x1074   :  { %v2116_v56 = vpop.f32.mrf.mxu0 }
0x1075   :  { %v2117_v57 = vadd.f32 %v2183_v55, %v2116_v56 }
0x1076   :  { %v2466_v58 = vpop.f32.mrf.mxu0 }
0x1077   :  { %2121 = vrot.lane.b32.xlu1 %v2117_v57, %s2564_s5 }
0x10e9   :  { %v2122_v59 = vpop.permute.xlu1 %2121 }
0x10ea   :  { %v2124_v60 = vadd.f32 %v2122_v59, %v1970_v47 }
0x10ec   :  { %2126 = vrot.lane.b32.xlu0 %v2124_v60, %s2551_s20 }
0x110b   :  { %1089 = vadd.xlane.f32.xlu0 %v1088_v4 }
0x115e   :  { %v2127_v63 = vpop.permute.xlu0 %2126 }
0x115f   :  { %v2129_v7 = vsel %vm76_vm1, %v2127_v63, 0.0 }
0x1160   :  { %2130 = vadd.xlane.f32.xlu1 %v2129_v7 }
0x1194   :  { %v1090_v9 = vpop.xlane.xlu0 %1089 }
0x1195   :  { %v1091_v10 = vmul.f32 0.03125, %v1090_v9 }
0x1197   :  { %v1092_v11 = vsub.f32 %v1087_v6, %v1091_v10 }
0x1199   :  { %v1093_v12 = vmul.f32 %v1092_v11, %v1092_v11 }
0x119b   :  { %v1094_v61 = vsel %vm76_vm1, %v1093_v12, 0.0 }
0x119c   :  { %1095 = vadd.xlane.f32.xlu0 %v1094_v61 }
0x11e9   :  { %v2131_v8 = vpop.xlane.xlu1 %2130 }
0x11ea   :  { %v2132_v17 = vmul.f32 0.03125, %v2131_v8 }
0x11ec   :  { %v2133_v18 = vsub.f32 %v2124_v60, %v2132_v17 }
0x11ee   :  { %v2134_v16 = vmul.f32 %v2133_v18, %v2133_v18 }
0x11f0   :  { %2136 = vrot.lane.b32.xlu1 %v2134_v16, %s2551_s20 }
0x11f4   :  { %2152 = vrot.lane.b32.xlu1 %v2186_v54, %s2564_s5 }
0x1225   :  { %v1096_v19 = vpop.xlane.xlu0 %1095 }
0x1226   :  { %v1097_v20 = vmul.f32 0.03125, %v1096_v19 }
0x1228   :  { %v1098_v13 = vadd.f32 1e-05, %v1097_v20 }
0x122a   :  { %2521 = vrsqrt.f32 %v1098_v13 }
0x1237   :  { %v2522_v21 = vpop.eup %2521 }
0x1238   :  { %v1100_v37 = vmul.f32 %v2522_v21, %v1092_v11 }
0x123a   :  { %v1105_v22 = vmul.f32 %v2185_v14, %v1100_v37 }
0x123c   :  { %v1110_v23 = vadd.f32 %v2186_v54, %v1105_v22 }
0x123e   :  { %1111 = vst.msk [vmem:[%s3044_s8] sm:$0xff] %vm76_vm1, %v1110_v23 }
0x1262   :  { %v2137_v15 = vpop.permute.xlu1 %2136 }
0x1263   :  { %v2139_v38 = vsel %vm76_vm1, %v2137_v15, 0.0 }
0x1264   :  { %2140 = vadd.xlane.f32.xlu0 %v2139_v38 }
0x1266   :  { %v2153_v41 = vpop.permute.xlu1 %2152 }
0x127a   :  { %2147 = vrot.lane.b32.xlu0 %v2185_v14, %s2564_s5 }
0x12ed   :  { %v2141_v24 = vpop.xlane.xlu0 %2140 }
0x12ee   :  { %v2142_v39 = vmul.f32 0.03125, %v2141_v24 }
0x12f0   :  { %v2143_v25 = vadd.f32 1e-05, %v2142_v39 }
0x12f1   :  { %v2148_v27 = vpop.permute.xlu0 %2147 }
0x12f2   :  { %2523 = vrsqrt.f32 %v2143_v25 }
0x12ff   :  { %v2524_v40 = vpop.eup %2523 }
0x1300   :  { %v2145_v28 = vmul.f32 %v2524_v40, %v2133_v18 }
0x1302   :  { %v2150_v42 = vmul.f32 %v2148_v27, %v2145_v28 }
0x1304   :  { %v2155_v43 = vadd.f32 %v2153_v41, %v2150_v42 }
0x1306   :  { %2157 = vst.msk [vmem:[%s3044_s8] sm:$0xff] %vm2156_vm6, %v2155_v43 }
0x1307   :  { %2162 = vsyncpa [#allocation3], 1 }

</bundles_post_ra>
